<compile_context>
chip_gen: v7x
topology: tpu7x:2x2x1
jax: 0.10.0
libtpu: 0.0.40
codegen_flags: <defaults>
</compile_context>

<pallas_src>
import jax
import jax.numpy as jnp
from jax import lax
from jax.experimental import pallas as pl
from jax.experimental.pallas import tpu as pltpu


# -----------------------------------------------------------------------------
# Fused kernel: all LSTM layers + final Linear(H, 1) in one pallas_call.
# -----------------------------------------------------------------------------
def _make_fused_kernel(T, B_pad, D, H, num_layers):
    """Returns kernel(*refs) with positional refs:

      x_ref                                   (T*B_pad, D)   time-major, flat
      [w_ih_l (Din,4H), w_hh_l (H,4H), b_l (1,4H)] * num_layers
      fc_w_ref (H, 1), fc_b_ref (1, 1)
      out_ref  (B_pad, 1)
      gx_scr   (T*B_pad, 4H)   hoisted input projection (reused per layer)
      seq_scr  (T*B_pad, H)    hidden sequence handed to the next layer
    """
    H3 = 3 * H

    def kernel(*refs):
        x_ref = refs[0]
        w_refs = refs[1:1 + 3 * num_layers]
        fc_w_ref = refs[1 + 3 * num_layers]
        fc_b_ref = refs[2 + 3 * num_layers]
        out_ref = refs[3 + 3 * num_layers]
        gx_scr = refs[4 + 3 * num_layers]
        seq_scr = refs[5 + 3 * num_layers]

        h_last = None
        for layer in range(num_layers):
            w_ih_ref = w_refs[3 * layer + 0]
            w_hh_ref = w_refs[3 * layer + 1]
            b_ref = w_refs[3 * layer + 2]

            # ---- hoisted input projection: one big MXU matmul for all T steps
            inp = x_ref[...] if layer == 0 else seq_scr[...]
            gx_scr[...] = (
                jnp.dot(inp, w_ih_ref[...], preferred_element_type=jnp.float32)
                + b_ref[...]
            )

            w_hh = w_hh_ref[...]
            is_last_layer = layer == num_layers - 1

            # ---- sequential recurrence over time (h/c carried as values)
            def step(t, carry, w_hh=w_hh, write_seq=not is_last_layer):
                h, c = carry
                row = pl.multiple_of(t * B_pad, B_pad)
                gates = gx_scr[pl.ds(row, B_pad), :] + jnp.dot(
                    h, w_hh, preferred_element_type=jnp.float32)
                # gate order [i, f, o, g]: one sigmoid slab + one tanh slab
                sig = jax.nn.sigmoid(gates[:, :H3])
                i_g = sig[:, 0:H]
                f_g = sig[:, H:2 * H]
                o_g = sig[:, 2 * H:H3]
                g_g = jnp.tanh(gates[:, H3:])
                c_new = f_g * c + i_g * g_g
                h_new = o_g * jnp.tanh(c_new)
                if write_seq:                      # last layer only needs h_T
                    seq_scr[pl.ds(row, B_pad), :] = h_new
                return h_new, c_new

            h0 = jnp.zeros((B_pad, H), jnp.float32)
            c0 = jnp.zeros((B_pad, H), jnp.float32)
            h_last, _ = lax.fori_loop(0, T, step, (h0, c0), unroll=True)

        # ---- fused FC head on the final hidden state (single tiny store)
        out_ref[...] = (
            jnp.dot(h_last, fc_w_ref[...], preferred_element_type=jnp.float32)
            + fc_b_ref[...]
        )

    return kernel


def _fused_forward_2d(x2d, kparams, T, B_pad):
    """x2d: (T*B_pad, D) time-major flattened input.  Returns (B_pad, 1)."""
    D = x2d.shape[1]
    H = kparams["lstm"][0][1].shape[0]
    num_layers = len(kparams["lstm"])

    flat_weights = []
    in_specs = [pl.BlockSpec((T * B_pad, D), lambda: (0, 0))]
    for layer in range(num_layers):
        w_ih_t, w_hh_t, b = kparams["lstm"][layer]
        d_in = w_ih_t.shape[0]
        flat_weights += [w_ih_t, w_hh_t, b]
        in_specs += [
            pl.BlockSpec((d_in, 4 * H), lambda: (0, 0)),
            pl.BlockSpec((H, 4 * H), lambda: (0, 0)),
            pl.BlockSpec((1, 4 * H), lambda: (0, 0)),
        ]
    flat_weights += [kparams["fc_w_t"], kparams["fc_b"]]
    in_specs += [
        pl.BlockSpec((H, 1), lambda: (0, 0)),
        pl.BlockSpec((1, 1), lambda: (0, 0)),
    ]

    kernel = _make_fused_kernel(T, B_pad, D, H, num_layers)
    return pl.pallas_call(
        kernel,
        out_shape=jax.ShapeDtypeStruct((B_pad, 1), jnp.float32),
        in_specs=in_specs,
        out_specs=pl.BlockSpec((B_pad, 1), lambda: (0, 0)),
        scratch_shapes=[
            pltpu.VMEM((T * B_pad, 4 * H), jnp.float32),   # gates_x for all t
            pltpu.VMEM((T * B_pad, H), jnp.float32),       # hidden sequence
        ],
    )(x2d, *flat_weights)


# -----------------------------------------------------------------------------
# Forward wrapper (same contract as the PyTorch module: x is (B, T, D)).
# -----------------------------------------------------------------------------
@jax.jit
def lstm_predictor_forward(x, kparams):
    B, T, D = x.shape
    B_pad = ((B + 7) // 8) * 8                   # pad batch to sublane count
    x_t = jnp.transpose(x, (1, 0, 2)).astype(jnp.float32)   # (T, B, D)
    if B_pad != B:
        x_t = jnp.pad(x_t, ((0, 0), (0, B_pad - B), (0, 0)))
    x2d = x_t.reshape(T * B_pad, D)              # time-major, flat rows
    out_pad = _fused_forward_2d(x2d, kparams, T, B_pad)
    return out_pad[:B]                           # (B, 1)


# -----------------------------------------------------------------------------
# Synthetic parameters in PyTorch layout ([i,f,g,o] rows) + kernel conversion.
# -----------------------------------------------------------------------------
def init_torch_params(key, input_dim, hidden_dim, num_layers):
    H = hidden_dim
    scale = 1.0 / (hidden_dim ** 0.5)
    layers = []
    for layer in range(num_layers):
        d_in = input_dim if layer == 0 else hidden_dim
        key, k1, k2, k3, k4 = jax.random.split(key, 5)
        w_ih = jax.random.uniform(k1, (4 * H, d_in), jnp.float32, -scale, scale)
        w_hh = jax.random.uniform(k2, (4 * H, H), jnp.float32, -scale, scale)
        b_ih = jax.random.uniform(k3, (4 * H,), jnp.float32, -scale, scale)
        b_hh = jax.random.uniform(k4, (4 * H,), jnp.float32, -scale, scale)
        layers.append((w_ih, w_hh, b_ih, b_hh))
    key, k5, k6 = jax.random.split(key, 3)
    fc_w = jax.random.uniform(k5, (1, H), jnp.float32, -scale, scale)
    fc_b = jax.random.uniform(k6, (1,), jnp.float32, -scale, scale)
    return {"lstm": layers, "fc_w": fc_w, "fc_b": fc_b}


def convert_params(torch_params, hidden_dim):
    """PyTorch layout -> kernel layout: reorder gate rows [i,f,g,o]->[i,f,o,g],
    transpose weights to (Din,4H)/(H,4H), fuse b_ih+b_hh."""
    H = hidden_dim

    def reorder(w):
        return jnp.concatenate(
            [w[0:H], w[H:2 * H], w[3 * H:4 * H], w[2 * H:3 * H]], axis=0)

    lstm = []
    for (w_ih, w_hh, b_ih, b_hh) in torch_params["lstm"]:
        lstm.append((reorder(w_ih).T, reorder(w_hh).T,
                     reorder(b_ih + b_hh).reshape(1, 4 * H)))
    return {"lstm": lstm,
            "fc_w_t": torch_params["fc_w"].T,        # (H, 1)
            "fc_b": torch_params["fc_b"].reshape(1, 1)}


# -----------------------------------------------------------------------------
# Pure-JAX reference in native PyTorch gate order for verification.
# -----------------------------------------------------------------------------
def reference_forward(x, torch_params):
    B, T, _ = x.shape
    seq = x
    for (w_ih, w_hh, b_ih, b_hh) in torch_params["lstm"]:
        H = w_hh.shape[1]
        h = jnp.zeros((B, H), jnp.float32)
        c = jnp.zeros((B, H), jnp.float32)
        outs = []
        for t in range(T):
            gates = seq[:, t, :] @ w_ih.T + h @ w_hh.T + b_ih + b_hh
            i = jax.nn.sigmoid(gates[:, 0 * H:1 * H])
            f = jax.nn.sigmoid(gates[:, 1 * H:2 * H])
            g = jnp.tanh(gates[:, 2 * H:3 * H])
            o = jax.nn.sigmoid(gates[:, 3 * H:4 * H])
            c = f * c + i * g
            h = o * jnp.tanh(c)
            outs.append(h)
        seq = jnp.stack(outs, axis=1)
    return seq[:, -1, :] @ torch_params["fc_w"].T + torch_params["fc_b"]


if __name__ == "__main__":
    batch, seq_len, input_dim, hidden_dim, num_layers = 2, 8, 8, 32, 2

    key = jax.random.PRNGKey(0)
    key, kx = jax.random.split(key)
    x = jax.random.normal(kx, (batch, seq_len, input_dim), jnp.float32)

    torch_params = init_torch_params(key, input_dim, hidden_dim, num_layers)
    kparams = convert_params(torch_params, hidden_dim)

    out = lstm_predictor_forward(x, kparams)
    jax.block_until_ready(out)

    ref = reference_forward(x, torch_params)
    assert out.shape == (batch, 1), out.shape
    assert jnp.allclose(out, ref, atol=1e-4, rtol=1e-4), (out, ref)

    print("KERNEL_OK")
</pallas_src>

<mosaic_0001>
module attributes {stable_mosaic.version = 11 : i64} {
  func.func @kernel(%arg0: memref<64x8xf32, #tpu.memory_space<vmem>>, %arg1: memref<8x128xf32, #tpu.memory_space<vmem>>, %arg2: memref<32x128xf32, #tpu.memory_space<vmem>>, %arg3: memref<1x128xf32, #tpu.memory_space<vmem>>, %arg4: memref<32x128xf32, #tpu.memory_space<vmem>>, %arg5: memref<32x128xf32, #tpu.memory_space<vmem>>, %arg6: memref<1x128xf32, #tpu.memory_space<vmem>>, %arg7: memref<32x1xf32, #tpu.memory_space<vmem>>, %arg8: memref<1x1xf32, #tpu.memory_space<vmem>>, %arg9: memref<8x1xf32, #tpu.memory_space<vmem>>, %arg10: memref<64x128xf32, #tpu.memory_space<vmem>>, %arg11: memref<64x32xf32, #tpu.memory_space<vmem>>) attributes {dimension_semantics = [], scalar_prefetch = 0 : i64, scratch_operands = 2 : i64, tpu.core_type = #tpu.core_type<tc>} {
    %c0 = arith.constant 0 : index
    %c0_0 = arith.constant 0 : index
    %0 = vector.load %arg0[%c0, %c0_0] : memref<64x8xf32, #tpu.memory_space<vmem>>, vector<64x8xf32>
    %c0_1 = arith.constant 0 : index
    %c0_2 = arith.constant 0 : index
    %1 = vector.load %arg1[%c0_1, %c0_2] : memref<8x128xf32, #tpu.memory_space<vmem>>, vector<8x128xf32>
    %cst = arith.constant dense<0.000000e+00> : vector<64x128xf32>
    %2 = tpu.matmul %0, %1, %cst {dimension_numbers = #tpu.dot_dimension_numbers<[1], [0], [0], [1], [0, 0, 1, 1], [], []>} : vector<64x8xf32>, vector<8x128xf32>, vector<64x128xf32> -> vector<64x128xf32>
    %c0_3 = arith.constant 0 : index
    %c0_4 = arith.constant 0 : index
    %3 = vector.load %arg3[%c0_3, %c0_4] : memref<1x128xf32, #tpu.memory_space<vmem>>, vector<1x128xf32>
    %4 = vector.broadcast %3 : vector<1x128xf32> to vector<64x128xf32>
    %5 = arith.addf %2, %4 : vector<64x128xf32>
    %c0_5 = arith.constant 0 : index
    %c0_6 = arith.constant 0 : index
    %6 = vector.load %arg10[%c0_5, %c0_6] : memref<64x128xf32, #tpu.memory_space<vmem>>, vector<64x128xf32>
    tpu.vector_store %arg10[%c0_5, %c0_6], %5 {strides = array<i32>} : memref<64x128xf32, #tpu.memory_space<vmem>>, vector<64x128xf32>,
    %c0_7 = arith.constant 0 : index
    %c0_8 = arith.constant 0 : index
    %7 = vector.load %arg2[%c0_7, %c0_8] : memref<32x128xf32, #tpu.memory_space<vmem>>, vector<32x128xf32>
    %cst_9 = arith.constant 0.000000e+00 : f32
    %8 = vector.broadcast %cst_9 : f32 to vector<8x32xf32>
    %cst_10 = arith.constant 0.000000e+00 : f32
    %9 = vector.broadcast %cst_10 : f32 to vector<8x32xf32>
    %c0_i32 = arith.constant 0 : i32
    %c8_i32 = arith.constant 8 : i32
    %10 = arith.muli %c0_i32, %c8_i32 : i32
    %11 = tpu.assume_multiple %10, 8 : i32
    %12 = arith.index_cast %11 : i32 to index
    %c0_11 = arith.constant 0 : index
    %13 = vector.load %arg10[%12, %c0_11] : memref<64x128xf32, #tpu.memory_space<vmem>>, vector<8x128xf32>
    %cst_12 = arith.constant dense<0.000000e+00> : vector<8x128xf32>
    %14 = tpu.matmul %8, %7, %cst_12 {dimension_numbers = #tpu.dot_dimension_numbers<[1], [0], [0], [1], [0, 0, 1, 1], [], []>} : vector<8x32xf32>, vector<32x128xf32>, vector<8x128xf32> -> vector<8x128xf32>
    %15 = arith.addf %13, %14 : vector<8x128xf32>
    %16 = vector.extract_strided_slice %15 {offsets = [0, 0], sizes = [8, 96], strides = [1, 1]} : vector<8x128xf32> to vector<8x96xf32>
    %17 = arith.negf %16 : vector<8x96xf32>
    %18 = math.exp %17 : vector<8x96xf32>
    %cst_13 = arith.constant 1.000000e+00 : f32
    %19 = vector.broadcast %cst_13 : f32 to vector<8x96xf32>
    %20 = arith.addf %19, %18 : vector<8x96xf32>
    %21 = arith.divf %19, %20 : vector<8x96xf32>
    %22 = vector.extract_strided_slice %21 {offsets = [0, 0], sizes = [8, 32], strides = [1, 1]} : vector<8x96xf32> to vector<8x32xf32>
    %23 = vector.extract_strided_slice %21 {offsets = [0, 32], sizes = [8, 32], strides = [1, 1]} : vector<8x96xf32> to vector<8x32xf32>
    %24 = vector.extract_strided_slice %21 {offsets = [0, 64], sizes = [8, 32], strides = [1, 1]} : vector<8x96xf32> to vector<8x32xf32>
    %25 = vector.extract_strided_slice %15 {offsets = [0, 96], sizes = [8, 32], strides = [1, 1]} : vector<8x128xf32> to vector<8x32xf32>
    %26 = math.tanh %25 : vector<8x32xf32>
    %27 = arith.mulf %23, %9 : vector<8x32xf32>
    %28 = arith.mulf %22, %26 : vector<8x32xf32>
    %29 = arith.addf %27, %28 : vector<8x32xf32>
    %30 = math.tanh %29 : vector<8x32xf32>
    %31 = arith.mulf %24, %30 : vector<8x32xf32>
    %32 = arith.index_cast %11 : i32 to index
    %c0_14 = arith.constant 0 : index
    %33 = vector.load %arg11[%32, %c0_14] : memref<64x32xf32, #tpu.memory_space<vmem>>, vector<8x32xf32>
    tpu.vector_store %arg11[%32, %c0_14], %31 {strides = array<i32>} : memref<64x32xf32, #tpu.memory_space<vmem>>, vector<8x32xf32>,
    %c1_i32 = arith.constant 1 : i32
    %c8_i32_15 = arith.constant 8 : i32
    %34 = arith.muli %c1_i32, %c8_i32_15 : i32
    %35 = tpu.assume_multiple %34, 8 : i32
    %36 = arith.index_cast %35 : i32 to index
    %c0_16 = arith.constant 0 : index
    %37 = vector.load %arg10[%36, %c0_16] : memref<64x128xf32, #tpu.memory_space<vmem>>, vector<8x128xf32>
    %cst_17 = arith.constant dense<0.000000e+00> : vector<8x128xf32>
    %38 = tpu.matmul %31, %7, %cst_17 {dimension_numbers = #tpu.dot_dimension_numbers<[1], [0], [0], [1], [0, 0, 1, 1], [], []>} : vector<8x32xf32>, vector<32x128xf32>, vector<8x128xf32> -> vector<8x128xf32>
    %39 = arith.addf %37, %38 : vector<8x128xf32>
    %40 = vector.extract_strided_slice %39 {offsets = [0, 0], sizes = [8, 96], strides = [1, 1]} : vector<8x128xf32> to vector<8x96xf32>
    %41 = arith.negf %40 : vector<8x96xf32>
    %42 = math.exp %41 : vector<8x96xf32>
    %cst_18 = arith.constant 1.000000e+00 : f32
    %43 = vector.broadcast %cst_18 : f32 to vector<8x96xf32>
    %44 = arith.addf %43, %42 : vector<8x96xf32>
    %45 = arith.divf %43, %44 : vector<8x96xf32>
    %46 = vector.extract_strided_slice %45 {offsets = [0, 0], sizes = [8, 32], strides = [1, 1]} : vector<8x96xf32> to vector<8x32xf32>
    %47 = vector.extract_strided_slice %45 {offsets = [0, 32], sizes = [8, 32], strides = [1, 1]} : vector<8x96xf32> to vector<8x32xf32>
    %48 = vector.extract_strided_slice %45 {offsets = [0, 64], sizes = [8, 32], strides = [1, 1]} : vector<8x96xf32> to vector<8x32xf32>
    %49 = vector.extract_strided_slice %39 {offsets = [0, 96], sizes = [8, 32], strides = [1, 1]} : vector<8x128xf32> to vector<8x32xf32>
    %50 = math.tanh %49 : vector<8x32xf32>
    %51 = arith.mulf %47, %29 : vector<8x32xf32>
    %52 = arith.mulf %46, %50 : vector<8x32xf32>
    %53 = arith.addf %51, %52 : vector<8x32xf32>
    %54 = math.tanh %53 : vector<8x32xf32>
    %55 = arith.mulf %48, %54 : vector<8x32xf32>
    %56 = arith.index_cast %35 : i32 to index
    %c0_19 = arith.constant 0 : index
    %57 = vector.load %arg11[%56, %c0_19] : memref<64x32xf32, #tpu.memory_space<vmem>>, vector<8x32xf32>
    tpu.vector_store %arg11[%56, %c0_19], %55 {strides = array<i32>} : memref<64x32xf32, #tpu.memory_space<vmem>>, vector<8x32xf32>,
    %c2_i32 = arith.constant 2 : i32
    %c8_i32_20 = arith.constant 8 : i32
    %58 = arith.muli %c2_i32, %c8_i32_20 : i32
    %59 = tpu.assume_multiple %58, 8 : i32
    %60 = arith.index_cast %59 : i32 to index
    %c0_21 = arith.constant 0 : index
    %61 = vector.load %arg10[%60, %c0_21] : memref<64x128xf32, #tpu.memory_space<vmem>>, vector<8x128xf32>
    %cst_22 = arith.constant dense<0.000000e+00> : vector<8x128xf32>
    %62 = tpu.matmul %55, %7, %cst_22 {dimension_numbers = #tpu.dot_dimension_numbers<[1], [0], [0], [1], [0, 0, 1, 1], [], []>} : vector<8x32xf32>, vector<32x128xf32>, vector<8x128xf32> -> vector<8x128xf32>
    %63 = arith.addf %61, %62 : vector<8x128xf32>
    %64 = vector.extract_strided_slice %63 {offsets = [0, 0], sizes = [8, 96], strides = [1, 1]} : vector<8x128xf32> to vector<8x96xf32>
    %65 = arith.negf %64 : vector<8x96xf32>
    %66 = math.exp %65 : vector<8x96xf32>
    %cst_23 = arith.constant 1.000000e+00 : f32
    %67 = vector.broadcast %cst_23 : f32 to vector<8x96xf32>
    %68 = arith.addf %67, %66 : vector<8x96xf32>
    %69 = arith.divf %67, %68 : vector<8x96xf32>
    %70 = vector.extract_strided_slice %69 {offsets = [0, 0], sizes = [8, 32], strides = [1, 1]} : vector<8x96xf32> to vector<8x32xf32>
    %71 = vector.extract_strided_slice %69 {offsets = [0, 32], sizes = [8, 32], strides = [1, 1]} : vector<8x96xf32> to vector<8x32xf32>
    %72 = vector.extract_strided_slice %69 {offsets = [0, 64], sizes = [8, 32], strides = [1, 1]} : vector<8x96xf32> to vector<8x32xf32>
    %73 = vector.extract_strided_slice %63 {offsets = [0, 96], sizes = [8, 32], strides = [1, 1]} : vector<8x128xf32> to vector<8x32xf32>
    %74 = math.tanh %73 : vector<8x32xf32>
    %75 = arith.mulf %71, %53 : vector<8x32xf32>
    %76 = arith.mulf %70, %74 : vector<8x32xf32>
    %77 = arith.addf %75, %76 : vector<8x32xf32>
    %78 = math.tanh %77 : vector<8x32xf32>
    %79 = arith.mulf %72, %78 : vector<8x32xf32>
    %80 = arith.index_cast %59 : i32 to index
    %c0_24 = arith.constant 0 : index
    %81 = vector.load %arg11[%80, %c0_24] : memref<64x32xf32, #tpu.memory_space<vmem>>, vector<8x32xf32>
    tpu.vector_store %arg11[%80, %c0_24], %79 {strides = array<i32>} : memref<64x32xf32, #tpu.memory_space<vmem>>, vector<8x32xf32>,
    %c3_i32 = arith.constant 3 : i32
    %c8_i32_25 = arith.constant 8 : i32
    %82 = arith.muli %c3_i32, %c8_i32_25 : i32
    %83 = tpu.assume_multiple %82, 8 : i32
    %84 = arith.index_cast %83 : i32 to index
    %c0_26 = arith.constant 0 : index
    %85 = vector.load %arg10[%84, %c0_26] : memref<64x128xf32, #tpu.memory_space<vmem>>, vector<8x128xf32>
    %cst_27 = arith.constant dense<0.000000e+00> : vector<8x128xf32>
    %86 = tpu.matmul %79, %7, %cst_27 {dimension_numbers = #tpu.dot_dimension_numbers<[1], [0], [0], [1], [0, 0, 1, 1], [], []>} : vector<8x32xf32>, vector<32x128xf32>, vector<8x128xf32> -> vector<8x128xf32>
    %87 = arith.addf %85, %86 : vector<8x128xf32>
    %88 = vector.extract_strided_slice %87 {offsets = [0, 0], sizes = [8, 96], strides = [1, 1]} : vector<8x128xf32> to vector<8x96xf32>
    %89 = arith.negf %88 : vector<8x96xf32>
    %90 = math.exp %89 : vector<8x96xf32>
    %cst_28 = arith.constant 1.000000e+00 : f32
    %91 = vector.broadcast %cst_28 : f32 to vector<8x96xf32>
    %92 = arith.addf %91, %90 : vector<8x96xf32>
    %93 = arith.divf %91, %92 : vector<8x96xf32>
    %94 = vector.extract_strided_slice %93 {offsets = [0, 0], sizes = [8, 32], strides = [1, 1]} : vector<8x96xf32> to vector<8x32xf32>
    %95 = vector.extract_strided_slice %93 {offsets = [0, 32], sizes = [8, 32], strides = [1, 1]} : vector<8x96xf32> to vector<8x32xf32>
    %96 = vector.extract_strided_slice %93 {offsets = [0, 64], sizes = [8, 32], strides = [1, 1]} : vector<8x96xf32> to vector<8x32xf32>
    %97 = vector.extract_strided_slice %87 {offsets = [0, 96], sizes = [8, 32], strides = [1, 1]} : vector<8x128xf32> to vector<8x32xf32>
    %98 = math.tanh %97 : vector<8x32xf32>
    %99 = arith.mulf %95, %77 : vector<8x32xf32>
    %100 = arith.mulf %94, %98 : vector<8x32xf32>
    %101 = arith.addf %99, %100 : vector<8x32xf32>
    %102 = math.tanh %101 : vector<8x32xf32>
    %103 = arith.mulf %96, %102 : vector<8x32xf32>
    %104 = arith.index_cast %83 : i32 to index
    %c0_29 = arith.constant 0 : index
    %105 = vector.load %arg11[%104, %c0_29] : memref<64x32xf32, #tpu.memory_space<vmem>>, vector<8x32xf32>
    tpu.vector_store %arg11[%104, %c0_29], %103 {strides = array<i32>} : memref<64x32xf32, #tpu.memory_space<vmem>>, vector<8x32xf32>,
    %c4_i32 = arith.constant 4 : i32
    %c8_i32_30 = arith.constant 8 : i32
    %106 = arith.muli %c4_i32, %c8_i32_30 : i32
    %107 = tpu.assume_multiple %106, 8 : i32
    %108 = arith.index_cast %107 : i32 to index
    %c0_31 = arith.constant 0 : index
    %109 = vector.load %arg10[%108, %c0_31] : memref<64x128xf32, #tpu.memory_space<vmem>>, vector<8x128xf32>
    %cst_32 = arith.constant dense<0.000000e+00> : vector<8x128xf32>
    %110 = tpu.matmul %103, %7, %cst_32 {dimension_numbers = #tpu.dot_dimension_numbers<[1], [0], [0], [1], [0, 0, 1, 1], [], []>} : vector<8x32xf32>, vector<32x128xf32>, vector<8x128xf32> -> vector<8x128xf32>
    %111 = arith.addf %109, %110 : vector<8x128xf32>
    %112 = vector.extract_strided_slice %111 {offsets = [0, 0], sizes = [8, 96], strides = [1, 1]} : vector<8x128xf32> to vector<8x96xf32>
    %113 = arith.negf %112 : vector<8x96xf32>
    %114 = math.exp %113 : vector<8x96xf32>
    %cst_33 = arith.constant 1.000000e+00 : f32
    %115 = vector.broadcast %cst_33 : f32 to vector<8x96xf32>
    %116 = arith.addf %115, %114 : vector<8x96xf32>
    %117 = arith.divf %115, %116 : vector<8x96xf32>
    %118 = vector.extract_strided_slice %117 {offsets = [0, 0], sizes = [8, 32], strides = [1, 1]} : vector<8x96xf32> to vector<8x32xf32>
    %119 = vector.extract_strided_slice %117 {offsets = [0, 32], sizes = [8, 32], strides = [1, 1]} : vector<8x96xf32> to vector<8x32xf32>
    %120 = vector.extract_strided_slice %117 {offsets = [0, 64], sizes = [8, 32], strides = [1, 1]} : vector<8x96xf32> to vector<8x32xf32>
    %121 = vector.extract_strided_slice %111 {offsets = [0, 96], sizes = [8, 32], strides = [1, 1]} : vector<8x128xf32> to vector<8x32xf32>
    %122 = math.tanh %121 : vector<8x32xf32>
    %123 = arith.mulf %119, %101 : vector<8x32xf32>
    %124 = arith.mulf %118, %122 : vector<8x32xf32>
    %125 = arith.addf %123, %124 : vector<8x32xf32>
    %126 = math.tanh %125 : vector<8x32xf32>
    %127 = arith.mulf %120, %126 : vector<8x32xf32>
    %128 = arith.index_cast %107 : i32 to index
    %c0_34 = arith.constant 0 : index
    %129 = vector.load %arg11[%128, %c0_34] : memref<64x32xf32, #tpu.memory_space<vmem>>, vector<8x32xf32>
    tpu.vector_store %arg11[%128, %c0_34], %127 {strides = array<i32>} : memref<64x32xf32, #tpu.memory_space<vmem>>, vector<8x32xf32>,
    %c5_i32 = arith.constant 5 : i32
    %c8_i32_35 = arith.constant 8 : i32
    %130 = arith.muli %c5_i32, %c8_i32_35 : i32
    %131 = tpu.assume_multiple %130, 8 : i32
    %132 = arith.index_cast %131 : i32 to index
    %c0_36 = arith.constant 0 : index
    %133 = vector.load %arg10[%132, %c0_36] : memref<64x128xf32, #tpu.memory_space<vmem>>, vector<8x128xf32>
    %cst_37 = arith.constant dense<0.000000e+00> : vector<8x128xf32>
    %134 = tpu.matmul %127, %7, %cst_37 {dimension_numbers = #tpu.dot_dimension_numbers<[1], [0], [0], [1], [0, 0, 1, 1], [], []>} : vector<8x32xf32>, vector<32x128xf32>, vector<8x128xf32> -> vector<8x128xf32>
    %135 = arith.addf %133, %134 : vector<8x128xf32>
    %136 = vector.extract_strided_slice %135 {offsets = [0, 0], sizes = [8, 96], strides = [1, 1]} : vector<8x128xf32> to vector<8x96xf32>
    %137 = arith.negf %136 : vector<8x96xf32>
    %138 = math.exp %137 : vector<8x96xf32>
    %cst_38 = arith.constant 1.000000e+00 : f32
    %139 = vector.broadcast %cst_38 : f32 to vector<8x96xf32>
    %140 = arith.addf %139, %138 : vector<8x96xf32>
    %141 = arith.divf %139, %140 : vector<8x96xf32>
    %142 = vector.extract_strided_slice %141 {offsets = [0, 0], sizes = [8, 32], strides = [1, 1]} : vector<8x96xf32> to vector<8x32xf32>
    %143 = vector.extract_strided_slice %141 {offsets = [0, 32], sizes = [8, 32], strides = [1, 1]} : vector<8x96xf32> to vector<8x32xf32>
    %144 = vector.extract_strided_slice %141 {offsets = [0, 64], sizes = [8, 32], strides = [1, 1]} : vector<8x96xf32> to vector<8x32xf32>
    %145 = vector.extract_strided_slice %135 {offsets = [0, 96], sizes = [8, 32], strides = [1, 1]} : vector<8x128xf32> to vector<8x32xf32>
    %146 = math.tanh %145 : vector<8x32xf32>
    %147 = arith.mulf %143, %125 : vector<8x32xf32>
    %148 = arith.mulf %142, %146 : vector<8x32xf32>
    %149 = arith.addf %147, %148 : vector<8x32xf32>
    %150 = math.tanh %149 : vector<8x32xf32>
    %151 = arith.mulf %144, %150 : vector<8x32xf32>
    %152 = arith.index_cast %131 : i32 to index
    %c0_39 = arith.constant 0 : index
    %153 = vector.load %arg11[%152, %c0_39] : memref<64x32xf32, #tpu.memory_space<vmem>>, vector<8x32xf32>
    tpu.vector_store %arg11[%152, %c0_39], %151 {strides = array<i32>} : memref<64x32xf32, #tpu.memory_space<vmem>>, vector<8x32xf32>,
    %c6_i32 = arith.constant 6 : i32
    %c8_i32_40 = arith.constant 8 : i32
    %154 = arith.muli %c6_i32, %c8_i32_40 : i32
    %155 = tpu.assume_multiple %154, 8 : i32
    %156 = arith.index_cast %155 : i32 to index
    %c0_41 = arith.constant 0 : index
    %157 = vector.load %arg10[%156, %c0_41] : memref<64x128xf32, #tpu.memory_space<vmem>>, vector<8x128xf32>
    %cst_42 = arith.constant dense<0.000000e+00> : vector<8x128xf32>
    %158 = tpu.matmul %151, %7, %cst_42 {dimension_numbers = #tpu.dot_dimension_numbers<[1], [0], [0], [1], [0, 0, 1, 1], [], []>} : vector<8x32xf32>, vector<32x128xf32>, vector<8x128xf32> -> vector<8x128xf32>
    %159 = arith.addf %157, %158 : vector<8x128xf32>
    %160 = vector.extract_strided_slice %159 {offsets = [0, 0], sizes = [8, 96], strides = [1, 1]} : vector<8x128xf32> to vector<8x96xf32>
    %161 = arith.negf %160 : vector<8x96xf32>
    %162 = math.exp %161 : vector<8x96xf32>
    %cst_43 = arith.constant 1.000000e+00 : f32
    %163 = vector.broadcast %cst_43 : f32 to vector<8x96xf32>
    %164 = arith.addf %163, %162 : vector<8x96xf32>
    %165 = arith.divf %163, %164 : vector<8x96xf32>
    %166 = vector.extract_strided_slice %165 {offsets = [0, 0], sizes = [8, 32], strides = [1, 1]} : vector<8x96xf32> to vector<8x32xf32>
    %167 = vector.extract_strided_slice %165 {offsets = [0, 32], sizes = [8, 32], strides = [1, 1]} : vector<8x96xf32> to vector<8x32xf32>
    %168 = vector.extract_strided_slice %165 {offsets = [0, 64], sizes = [8, 32], strides = [1, 1]} : vector<8x96xf32> to vector<8x32xf32>
    %169 = vector.extract_strided_slice %159 {offsets = [0, 96], sizes = [8, 32], strides = [1, 1]} : vector<8x128xf32> to vector<8x32xf32>
    %170 = math.tanh %169 : vector<8x32xf32>
    %171 = arith.mulf %167, %149 : vector<8x32xf32>
    %172 = arith.mulf %166, %170 : vector<8x32xf32>
    %173 = arith.addf %171, %172 : vector<8x32xf32>
    %174 = math.tanh %173 : vector<8x32xf32>
    %175 = arith.mulf %168, %174 : vector<8x32xf32>
    %176 = arith.index_cast %155 : i32 to index
    %c0_44 = arith.constant 0 : index
    %177 = vector.load %arg11[%176, %c0_44] : memref<64x32xf32, #tpu.memory_space<vmem>>, vector<8x32xf32>
    tpu.vector_store %arg11[%176, %c0_44], %175 {strides = array<i32>} : memref<64x32xf32, #tpu.memory_space<vmem>>, vector<8x32xf32>,
    %c7_i32 = arith.constant 7 : i32
    %c8_i32_45 = arith.constant 8 : i32
    %178 = arith.muli %c7_i32, %c8_i32_45 : i32
    %179 = tpu.assume_multiple %178, 8 : i32
    %180 = arith.index_cast %179 : i32 to index
    %c0_46 = arith.constant 0 : index
    %181 = vector.load %arg10[%180, %c0_46] : memref<64x128xf32, #tpu.memory_space<vmem>>, vector<8x128xf32>
    %cst_47 = arith.constant dense<0.000000e+00> : vector<8x128xf32>
    %182 = tpu.matmul %175, %7, %cst_47 {dimension_numbers = #tpu.dot_dimension_numbers<[1], [0], [0], [1], [0, 0, 1, 1], [], []>} : vector<8x32xf32>, vector<32x128xf32>, vector<8x128xf32> -> vector<8x128xf32>
    %183 = arith.addf %181, %182 : vector<8x128xf32>
    %184 = vector.extract_strided_slice %183 {offsets = [0, 0], sizes = [8, 96], strides = [1, 1]} : vector<8x128xf32> to vector<8x96xf32>
    %185 = arith.negf %184 : vector<8x96xf32>
    %186 = math.exp %185 : vector<8x96xf32>
    %cst_48 = arith.constant 1.000000e+00 : f32
    %187 = vector.broadcast %cst_48 : f32 to vector<8x96xf32>
    %188 = arith.addf %187, %186 : vector<8x96xf32>
    %189 = arith.divf %187, %188 : vector<8x96xf32>
    %190 = vector.extract_strided_slice %189 {offsets = [0, 0], sizes = [8, 32], strides = [1, 1]} : vector<8x96xf32> to vector<8x32xf32>
    %191 = vector.extract_strided_slice %189 {offsets = [0, 32], sizes = [8, 32], strides = [1, 1]} : vector<8x96xf32> to vector<8x32xf32>
    %192 = vector.extract_strided_slice %189 {offsets = [0, 64], sizes = [8, 32], strides = [1, 1]} : vector<8x96xf32> to vector<8x32xf32>
    %193 = vector.extract_strided_slice %183 {offsets = [0, 96], sizes = [8, 32], strides = [1, 1]} : vector<8x128xf32> to vector<8x32xf32>
    %194 = math.tanh %193 : vector<8x32xf32>
    %195 = arith.mulf %191, %173 : vector<8x32xf32>
    %196 = arith.mulf %190, %194 : vector<8x32xf32>
    %197 = arith.addf %195, %196 : vector<8x32xf32>
    %198 = math.tanh %197 : vector<8x32xf32>
    %199 = arith.mulf %192, %198 : vector<8x32xf32>
    %200 = arith.index_cast %179 : i32 to index
    %c0_49 = arith.constant 0 : index
    %201 = vector.load %arg11[%200, %c0_49] : memref<64x32xf32, #tpu.memory_space<vmem>>, vector<8x32xf32>
    tpu.vector_store %arg11[%200, %c0_49], %199 {strides = array<i32>} : memref<64x32xf32, #tpu.memory_space<vmem>>, vector<8x32xf32>,
    %c8_i32_50 = arith.constant 8 : i32
    %c0_51 = arith.constant 0 : index
    %c0_52 = arith.constant 0 : index
    %202 = vector.load %arg11[%c0_51, %c0_52] : memref<64x32xf32, #tpu.memory_space<vmem>>, vector<64x32xf32>
    %c0_53 = arith.constant 0 : index
    %c0_54 = arith.constant 0 : index
    %203 = vector.load %arg4[%c0_53, %c0_54] : memref<32x128xf32, #tpu.memory_space<vmem>>, vector<32x128xf32>
    %cst_55 = arith.constant dense<0.000000e+00> : vector<64x128xf32>
    %204 = tpu.matmul %202, %203, %cst_55 {dimension_numbers = #tpu.dot_dimension_numbers<[1], [0], [0], [1], [0, 0, 1, 1], [], []>} : vector<64x32xf32>, vector<32x128xf32>, vector<64x128xf32> -> vector<64x128xf32>
    %c0_56 = arith.constant 0 : index
    %c0_57 = arith.constant 0 : index
    %205 = vector.load %arg6[%c0_56, %c0_57] : memref<1x128xf32, #tpu.memory_space<vmem>>, vector<1x128xf32>
    %206 = vector.broadcast %205 : vector<1x128xf32> to vector<64x128xf32>
    %207 = arith.addf %204, %206 : vector<64x128xf32>
    %c0_58 = arith.constant 0 : index
    %c0_59 = arith.constant 0 : index
    %208 = vector.load %arg10[%c0_58, %c0_59] : memref<64x128xf32, #tpu.memory_space<vmem>>, vector<64x128xf32>
    tpu.vector_store %arg10[%c0_58, %c0_59], %207 {strides = array<i32>} : memref<64x128xf32, #tpu.memory_space<vmem>>, vector<64x128xf32>,
    %c0_60 = arith.constant 0 : index
    %c0_61 = arith.constant 0 : index
    %209 = vector.load %arg5[%c0_60, %c0_61] : memref<32x128xf32, #tpu.memory_space<vmem>>, vector<32x128xf32>
    %cst_62 = arith.constant 0.000000e+00 : f32
    %210 = vector.broadcast %cst_62 : f32 to vector<8x32xf32>
    %cst_63 = arith.constant 0.000000e+00 : f32
    %211 = vector.broadcast %cst_63 : f32 to vector<8x32xf32>
    %c0_i32_64 = arith.constant 0 : i32
    %c8_i32_65 = arith.constant 8 : i32
    %212 = arith.muli %c0_i32_64, %c8_i32_65 : i32
    %213 = tpu.assume_multiple %212, 8 : i32
    %214 = arith.index_cast %213 : i32 to index
    %c0_66 = arith.constant 0 : index
    %215 = vector.load %arg10[%214, %c0_66] : memref<64x128xf32, #tpu.memory_space<vmem>>, vector<8x128xf32>
    %cst_67 = arith.constant dense<0.000000e+00> : vector<8x128xf32>
    %216 = tpu.matmul %210, %209, %cst_67 {dimension_numbers = #tpu.dot_dimension_numbers<[1], [0], [0], [1], [0, 0, 1, 1], [], []>} : vector<8x32xf32>, vector<32x128xf32>, vector<8x128xf32> -> vector<8x128xf32>
    %217 = arith.addf %215, %216 : vector<8x128xf32>
    %218 = vector.extract_strided_slice %217 {offsets = [0, 0], sizes = [8, 96], strides = [1, 1]} : vector<8x128xf32> to vector<8x96xf32>
    %219 = arith.negf %218 : vector<8x96xf32>
    %220 = math.exp %219 : vector<8x96xf32>
    %cst_68 = arith.constant 1.000000e+00 : f32
    %221 = vector.broadcast %cst_68 : f32 to vector<8x96xf32>
    %222 = arith.addf %221, %220 : vector<8x96xf32>
    %223 = arith.divf %221, %222 : vector<8x96xf32>
    %224 = vector.extract_strided_slice %223 {offsets = [0, 0], sizes = [8, 32], strides = [1, 1]} : vector<8x96xf32> to vector<8x32xf32>
    %225 = vector.extract_strided_slice %223 {offsets = [0, 32], sizes = [8, 32], strides = [1, 1]} : vector<8x96xf32> to vector<8x32xf32>
    %226 = vector.extract_strided_slice %223 {offsets = [0, 64], sizes = [8, 32], strides = [1, 1]} : vector<8x96xf32> to vector<8x32xf32>
    %227 = vector.extract_strided_slice %217 {offsets = [0, 96], sizes = [8, 32], strides = [1, 1]} : vector<8x128xf32> to vector<8x32xf32>
    %228 = math.tanh %227 : vector<8x32xf32>
    %229 = arith.mulf %225, %211 : vector<8x32xf32>
    %230 = arith.mulf %224, %228 : vector<8x32xf32>
    %231 = arith.addf %229, %230 : vector<8x32xf32>
    %232 = math.tanh %231 : vector<8x32xf32>
    %233 = arith.mulf %226, %232 : vector<8x32xf32>
    %c1_i32_69 = arith.constant 1 : i32
    %c8_i32_70 = arith.constant 8 : i32
    %234 = arith.muli %c1_i32_69, %c8_i32_70 : i32
    %235 = tpu.assume_multiple %234, 8 : i32
    %236 = arith.index_cast %235 : i32 to index
    %c0_71 = arith.constant 0 : index
    %237 = vector.load %arg10[%236, %c0_71] : memref<64x128xf32, #tpu.memory_space<vmem>>, vector<8x128xf32>
    %cst_72 = arith.constant dense<0.000000e+00> : vector<8x128xf32>
    %238 = tpu.matmul %233, %209, %cst_72 {dimension_numbers = #tpu.dot_dimension_numbers<[1], [0], [0], [1], [0, 0, 1, 1], [], []>} : vector<8x32xf32>, vector<32x128xf32>, vector<8x128xf32> -> vector<8x128xf32>
    %239 = arith.addf %237, %238 : vector<8x128xf32>
    %240 = vector.extract_strided_slice %239 {offsets = [0, 0], sizes = [8, 96], strides = [1, 1]} : vector<8x128xf32> to vector<8x96xf32>
    %241 = arith.negf %240 : vector<8x96xf32>
    %242 = math.exp %241 : vector<8x96xf32>
    %cst_73 = arith.constant 1.000000e+00 : f32
    %243 = vector.broadcast %cst_73 : f32 to vector<8x96xf32>
    %244 = arith.addf %243, %242 : vector<8x96xf32>
    %245 = arith.divf %243, %244 : vector<8x96xf32>
    %246 = vector.extract_strided_slice %245 {offsets = [0, 0], sizes = [8, 32], strides = [1, 1]} : vector<8x96xf32> to vector<8x32xf32>
    %247 = vector.extract_strided_slice %245 {offsets = [0, 32], sizes = [8, 32], strides = [1, 1]} : vector<8x96xf32> to vector<8x32xf32>
    %248 = vector.extract_strided_slice %245 {offsets = [0, 64], sizes = [8, 32], strides = [1, 1]} : vector<8x96xf32> to vector<8x32xf32>
    %249 = vector.extract_strided_slice %239 {offsets = [0, 96], sizes = [8, 32], strides = [1, 1]} : vector<8x128xf32> to vector<8x32xf32>
    %250 = math.tanh %249 : vector<8x32xf32>
    %251 = arith.mulf %247, %231 : vector<8x32xf32>
    %252 = arith.mulf %246, %250 : vector<8x32xf32>
    %253 = arith.addf %251, %252 : vector<8x32xf32>
    %254 = math.tanh %253 : vector<8x32xf32>
    %255 = arith.mulf %248, %254 : vector<8x32xf32>
    %c2_i32_74 = arith.constant 2 : i32
    %c8_i32_75 = arith.constant 8 : i32
    %256 = arith.muli %c2_i32_74, %c8_i32_75 : i32
    %257 = tpu.assume_multiple %256, 8 : i32
    %258 = arith.index_cast %257 : i32 to index
    %c0_76 = arith.constant 0 : index
    %259 = vector.load %arg10[%258, %c0_76] : memref<64x128xf32, #tpu.memory_space<vmem>>, vector<8x128xf32>
    %cst_77 = arith.constant dense<0.000000e+00> : vector<8x128xf32>
    %260 = tpu.matmul %255, %209, %cst_77 {dimension_numbers = #tpu.dot_dimension_numbers<[1], [0], [0], [1], [0, 0, 1, 1], [], []>} : vector<8x32xf32>, vector<32x128xf32>, vector<8x128xf32> -> vector<8x128xf32>
    %261 = arith.addf %259, %260 : vector<8x128xf32>
    %262 = vector.extract_strided_slice %261 {offsets = [0, 0], sizes = [8, 96], strides = [1, 1]} : vector<8x128xf32> to vector<8x96xf32>
    %263 = arith.negf %262 : vector<8x96xf32>
    %264 = math.exp %263 : vector<8x96xf32>
    %cst_78 = arith.constant 1.000000e+00 : f32
    %265 = vector.broadcast %cst_78 : f32 to vector<8x96xf32>
    %266 = arith.addf %265, %264 : vector<8x96xf32>
    %267 = arith.divf %265, %266 : vector<8x96xf32>
    %268 = vector.extract_strided_slice %267 {offsets = [0, 0], sizes = [8, 32], strides = [1, 1]} : vector<8x96xf32> to vector<8x32xf32>
    %269 = vector.extract_strided_slice %267 {offsets = [0, 32], sizes = [8, 32], strides = [1, 1]} : vector<8x96xf32> to vector<8x32xf32>
    %270 = vector.extract_strided_slice %267 {offsets = [0, 64], sizes = [8, 32], strides = [1, 1]} : vector<8x96xf32> to vector<8x32xf32>
    %271 = vector.extract_strided_slice %261 {offsets = [0, 96], sizes = [8, 32], strides = [1, 1]} : vector<8x128xf32> to vector<8x32xf32>
    %272 = math.tanh %271 : vector<8x32xf32>
    %273 = arith.mulf %269, %253 : vector<8x32xf32>
    %274 = arith.mulf %268, %272 : vector<8x32xf32>
    %275 = arith.addf %273, %274 : vector<8x32xf32>
    %276 = math.tanh %275 : vector<8x32xf32>
    %277 = arith.mulf %270, %276 : vector<8x32xf32>
    %c3_i32_79 = arith.constant 3 : i32
    %c8_i32_80 = arith.constant 8 : i32
    %278 = arith.muli %c3_i32_79, %c8_i32_80 : i32
    %279 = tpu.assume_multiple %278, 8 : i32
    %280 = arith.index_cast %279 : i32 to index
    %c0_81 = arith.constant 0 : index
    %281 = vector.load %arg10[%280, %c0_81] : memref<64x128xf32, #tpu.memory_space<vmem>>, vector<8x128xf32>
    %cst_82 = arith.constant dense<0.000000e+00> : vector<8x128xf32>
    %282 = tpu.matmul %277, %209, %cst_82 {dimension_numbers = #tpu.dot_dimension_numbers<[1], [0], [0], [1], [0, 0, 1, 1], [], []>} : vector<8x32xf32>, vector<32x128xf32>, vector<8x128xf32> -> vector<8x128xf32>
    %283 = arith.addf %281, %282 : vector<8x128xf32>
    %284 = vector.extract_strided_slice %283 {offsets = [0, 0], sizes = [8, 96], strides = [1, 1]} : vector<8x128xf32> to vector<8x96xf32>
    %285 = arith.negf %284 : vector<8x96xf32>
    %286 = math.exp %285 : vector<8x96xf32>
    %cst_83 = arith.constant 1.000000e+00 : f32
    %287 = vector.broadcast %cst_83 : f32 to vector<8x96xf32>
    %288 = arith.addf %287, %286 : vector<8x96xf32>
    %289 = arith.divf %287, %288 : vector<8x96xf32>
    %290 = vector.extract_strided_slice %289 {offsets = [0, 0], sizes = [8, 32], strides = [1, 1]} : vector<8x96xf32> to vector<8x32xf32>
    %291 = vector.extract_strided_slice %289 {offsets = [0, 32], sizes = [8, 32], strides = [1, 1]} : vector<8x96xf32> to vector<8x32xf32>
    %292 = vector.extract_strided_slice %289 {offsets = [0, 64], sizes = [8, 32], strides = [1, 1]} : vector<8x96xf32> to vector<8x32xf32>
    %293 = vector.extract_strided_slice %283 {offsets = [0, 96], sizes = [8, 32], strides = [1, 1]} : vector<8x128xf32> to vector<8x32xf32>
    %294 = math.tanh %293 : vector<8x32xf32>
    %295 = arith.mulf %291, %275 : vector<8x32xf32>
    %296 = arith.mulf %290, %294 : vector<8x32xf32>
    %297 = arith.addf %295, %296 : vector<8x32xf32>
    %298 = math.tanh %297 : vector<8x32xf32>
    %299 = arith.mulf %292, %298 : vector<8x32xf32>
    %c4_i32_84 = arith.constant 4 : i32
    %c8_i32_85 = arith.constant 8 : i32
    %300 = arith.muli %c4_i32_84, %c8_i32_85 : i32
    %301 = tpu.assume_multiple %300, 8 : i32
    %302 = arith.index_cast %301 : i32 to index
    %c0_86 = arith.constant 0 : index
    %303 = vector.load %arg10[%302, %c0_86] : memref<64x128xf32, #tpu.memory_space<vmem>>, vector<8x128xf32>
    %cst_87 = arith.constant dense<0.000000e+00> : vector<8x128xf32>
    %304 = tpu.matmul %299, %209, %cst_87 {dimension_numbers = #tpu.dot_dimension_numbers<[1], [0], [0], [1], [0, 0, 1, 1], [], []>} : vector<8x32xf32>, vector<32x128xf32>, vector<8x128xf32> -> vector<8x128xf32>
    %305 = arith.addf %303, %304 : vector<8x128xf32>
    %306 = vector.extract_strided_slice %305 {offsets = [0, 0], sizes = [8, 96], strides = [1, 1]} : vector<8x128xf32> to vector<8x96xf32>
    %307 = arith.negf %306 : vector<8x96xf32>
    %308 = math.exp %307 : vector<8x96xf32>
    %cst_88 = arith.constant 1.000000e+00 : f32
    %309 = vector.broadcast %cst_88 : f32 to vector<8x96xf32>
    %310 = arith.addf %309, %308 : vector<8x96xf32>
    %311 = arith.divf %309, %310 : vector<8x96xf32>
    %312 = vector.extract_strided_slice %311 {offsets = [0, 0], sizes = [8, 32], strides = [1, 1]} : vector<8x96xf32> to vector<8x32xf32>
    %313 = vector.extract_strided_slice %311 {offsets = [0, 32], sizes = [8, 32], strides = [1, 1]} : vector<8x96xf32> to vector<8x32xf32>
    %314 = vector.extract_strided_slice %311 {offsets = [0, 64], sizes = [8, 32], strides = [1, 1]} : vector<8x96xf32> to vector<8x32xf32>
    %315 = vector.extract_strided_slice %305 {offsets = [0, 96], sizes = [8, 32], strides = [1, 1]} : vector<8x128xf32> to vector<8x32xf32>
    %316 = math.tanh %315 : vector<8x32xf32>
    %317 = arith.mulf %313, %297 : vector<8x32xf32>
    %318 = arith.mulf %312, %316 : vector<8x32xf32>
    %319 = arith.addf %317, %318 : vector<8x32xf32>
    %320 = math.tanh %319 : vector<8x32xf32>
    %321 = arith.mulf %314, %320 : vector<8x32xf32>
    %c5_i32_89 = arith.constant 5 : i32
    %c8_i32_90 = arith.constant 8 : i32
    %322 = arith.muli %c5_i32_89, %c8_i32_90 : i32
    %323 = tpu.assume_multiple %322, 8 : i32
    %324 = arith.index_cast %323 : i32 to index
    %c0_91 = arith.constant 0 : index
    %325 = vector.load %arg10[%324, %c0_91] : memref<64x128xf32, #tpu.memory_space<vmem>>, vector<8x128xf32>
    %cst_92 = arith.constant dense<0.000000e+00> : vector<8x128xf32>
    %326 = tpu.matmul %321, %209, %cst_92 {dimension_numbers = #tpu.dot_dimension_numbers<[1], [0], [0], [1], [0, 0, 1, 1], [], []>} : vector<8x32xf32>, vector<32x128xf32>, vector<8x128xf32> -> vector<8x128xf32>
    %327 = arith.addf %325, %326 : vector<8x128xf32>
    %328 = vector.extract_strided_slice %327 {offsets = [0, 0], sizes = [8, 96], strides = [1, 1]} : vector<8x128xf32> to vector<8x96xf32>
    %329 = arith.negf %328 : vector<8x96xf32>
    %330 = math.exp %329 : vector<8x96xf32>
    %cst_93 = arith.constant 1.000000e+00 : f32
    %331 = vector.broadcast %cst_93 : f32 to vector<8x96xf32>
    %332 = arith.addf %331, %330 : vector<8x96xf32>
    %333 = arith.divf %331, %332 : vector<8x96xf32>
    %334 = vector.extract_strided_slice %333 {offsets = [0, 0], sizes = [8, 32], strides = [1, 1]} : vector<8x96xf32> to vector<8x32xf32>
    %335 = vector.extract_strided_slice %333 {offsets = [0, 32], sizes = [8, 32], strides = [1, 1]} : vector<8x96xf32> to vector<8x32xf32>
    %336 = vector.extract_strided_slice %333 {offsets = [0, 64], sizes = [8, 32], strides = [1, 1]} : vector<8x96xf32> to vector<8x32xf32>
    %337 = vector.extract_strided_slice %327 {offsets = [0, 96], sizes = [8, 32], strides = [1, 1]} : vector<8x128xf32> to vector<8x32xf32>
    %338 = math.tanh %337 : vector<8x32xf32>
    %339 = arith.mulf %335, %319 : vector<8x32xf32>
    %340 = arith.mulf %334, %338 : vector<8x32xf32>
    %341 = arith.addf %339, %340 : vector<8x32xf32>
    %342 = math.tanh %341 : vector<8x32xf32>
    %343 = arith.mulf %336, %342 : vector<8x32xf32>
    %c6_i32_94 = arith.constant 6 : i32
    %c8_i32_95 = arith.constant 8 : i32
    %344 = arith.muli %c6_i32_94, %c8_i32_95 : i32
    %345 = tpu.assume_multiple %344, 8 : i32
    %346 = arith.index_cast %345 : i32 to index
    %c0_96 = arith.constant 0 : index
    %347 = vector.load %arg10[%346, %c0_96] : memref<64x128xf32, #tpu.memory_space<vmem>>, vector<8x128xf32>
    %cst_97 = arith.constant dense<0.000000e+00> : vector<8x128xf32>
    %348 = tpu.matmul %343, %209, %cst_97 {dimension_numbers = #tpu.dot_dimension_numbers<[1], [0], [0], [1], [0, 0, 1, 1], [], []>} : vector<8x32xf32>, vector<32x128xf32>, vector<8x128xf32> -> vector<8x128xf32>
    %349 = arith.addf %347, %348 : vector<8x128xf32>
    %350 = vector.extract_strided_slice %349 {offsets = [0, 0], sizes = [8, 96], strides = [1, 1]} : vector<8x128xf32> to vector<8x96xf32>
    %351 = arith.negf %350 : vector<8x96xf32>
    %352 = math.exp %351 : vector<8x96xf32>
    %cst_98 = arith.constant 1.000000e+00 : f32
    %353 = vector.broadcast %cst_98 : f32 to vector<8x96xf32>
    %354 = arith.addf %353, %352 : vector<8x96xf32>
    %355 = arith.divf %353, %354 : vector<8x96xf32>
    %356 = vector.extract_strided_slice %355 {offsets = [0, 0], sizes = [8, 32], strides = [1, 1]} : vector<8x96xf32> to vector<8x32xf32>
    %357 = vector.extract_strided_slice %355 {offsets = [0, 32], sizes = [8, 32], strides = [1, 1]} : vector<8x96xf32> to vector<8x32xf32>
    %358 = vector.extract_strided_slice %355 {offsets = [0, 64], sizes = [8, 32], strides = [1, 1]} : vector<8x96xf32> to vector<8x32xf32>
    %359 = vector.extract_strided_slice %349 {offsets = [0, 96], sizes = [8, 32], strides = [1, 1]} : vector<8x128xf32> to vector<8x32xf32>
    %360 = math.tanh %359 : vector<8x32xf32>
    %361 = arith.mulf %357, %341 : vector<8x32xf32>
    %362 = arith.mulf %356, %360 : vector<8x32xf32>
    %363 = arith.addf %361, %362 : vector<8x32xf32>
    %364 = math.tanh %363 : vector<8x32xf32>
    %365 = arith.mulf %358, %364 : vector<8x32xf32>
    %c7_i32_99 = arith.constant 7 : i32
    %c8_i32_100 = arith.constant 8 : i32
    %366 = arith.muli %c7_i32_99, %c8_i32_100 : i32
    %367 = tpu.assume_multiple %366, 8 : i32
    %368 = arith.index_cast %367 : i32 to index
    %c0_101 = arith.constant 0 : index
    %369 = vector.load %arg10[%368, %c0_101] : memref<64x128xf32, #tpu.memory_space<vmem>>, vector<8x128xf32>
    %cst_102 = arith.constant dense<0.000000e+00> : vector<8x128xf32>
    %370 = tpu.matmul %365, %209, %cst_102 {dimension_numbers = #tpu.dot_dimension_numbers<[1], [0], [0], [1], [0, 0, 1, 1], [], []>} : vector<8x32xf32>, vector<32x128xf32>, vector<8x128xf32> -> vector<8x128xf32>
    %371 = arith.addf %369, %370 : vector<8x128xf32>
    %372 = vector.extract_strided_slice %371 {offsets = [0, 0], sizes = [8, 96], strides = [1, 1]} : vector<8x128xf32> to vector<8x96xf32>
    %373 = arith.negf %372 : vector<8x96xf32>
    %374 = math.exp %373 : vector<8x96xf32>
    %cst_103 = arith.constant 1.000000e+00 : f32
    %375 = vector.broadcast %cst_103 : f32 to vector<8x96xf32>
    %376 = arith.addf %375, %374 : vector<8x96xf32>
    %377 = arith.divf %375, %376 : vector<8x96xf32>
    %378 = vector.extract_strided_slice %377 {offsets = [0, 0], sizes = [8, 32], strides = [1, 1]} : vector<8x96xf32> to vector<8x32xf32>
    %379 = vector.extract_strided_slice %377 {offsets = [0, 32], sizes = [8, 32], strides = [1, 1]} : vector<8x96xf32> to vector<8x32xf32>
    %380 = vector.extract_strided_slice %377 {offsets = [0, 64], sizes = [8, 32], strides = [1, 1]} : vector<8x96xf32> to vector<8x32xf32>
    %381 = vector.extract_strided_slice %371 {offsets = [0, 96], sizes = [8, 32], strides = [1, 1]} : vector<8x128xf32> to vector<8x32xf32>
    %382 = math.tanh %381 : vector<8x32xf32>
    %383 = arith.mulf %379, %363 : vector<8x32xf32>
    %384 = arith.mulf %378, %382 : vector<8x32xf32>
    %385 = arith.addf %383, %384 : vector<8x32xf32>
    %386 = math.tanh %385 : vector<8x32xf32>
    %387 = arith.mulf %380, %386 : vector<8x32xf32>
    %c8_i32_104 = arith.constant 8 : i32
    %c0_105 = arith.constant 0 : index
    %c0_106 = arith.constant 0 : index
    %388 = vector.load %arg7[%c0_105, %c0_106] : memref<32x1xf32, #tpu.memory_space<vmem>>, vector<32x1xf32>
    %cst_107 = arith.constant dense<0.000000e+00> : vector<8x1xf32>
    %389 = tpu.matmul %387, %388, %cst_107 {dimension_numbers = #tpu.dot_dimension_numbers<[1], [0], [0], [1], [0, 0, 1, 1], [], []>} : vector<8x32xf32>, vector<32x1xf32>, vector<8x1xf32> -> vector<8x1xf32>
    %c0_108 = arith.constant 0 : index
    %c0_109 = arith.constant 0 : index
    %390 = vector.load %arg8[%c0_108, %c0_109] : memref<1x1xf32, #tpu.memory_space<vmem>>, vector<1x1xf32>
    %391 = vector.broadcast %390 : vector<1x1xf32> to vector<8x1xf32>
    %392 = arith.addf %389, %391 : vector<8x1xf32>
    %c0_110 = arith.constant 0 : index
    %c0_111 = arith.constant 0 : index
    %393 = vector.load %arg9[%c0_110, %c0_111] : memref<8x1xf32, #tpu.memory_space<vmem>>, vector<8x1xf32>
    tpu.vector_store %arg9[%c0_110, %c0_111], %392 {strides = array<i32>} : memref<8x1xf32, #tpu.memory_space<vmem>>, vector<8x1xf32>,
    return
  }
}

</mosaic_0001>

<bundles_post_ra>
// kernel: lstm_predictor_forward.1
= control target key start
LH: loop header
LB: loop body
LE: loop exit
PB: predicated region body
PF: predicated region fallthrough
CT: control target
= control target key end

     0   :  { %vm50_vm0 = vcmask 64512   ;;  %v2707_v0 = vmov 0.0|0.0   ;;  %vm2708_vm1 = vmmov 0   ;;  %v2709_v4 = vmov 0.0   ;;  %s2710_s23 = smov 32   ;;  %s3119_s2 = inlined_call_operand.vmem [shape: f32[32,128], index: 2, kind: input, shape index: {}]   ;;  %s3120_s1 = inlined_call_operand.vmem [shape: f32[8,128], index: 1, kind: input, shape index: {}]   ;;  %s3121_s0 = inlined_call_operand.vmem [shape: f32[64,8], index: 0, kind: input, shape index: {}]   ;;  %s3122_s3 = inlined_call_operand.vmem [shape: f32[1,128], index: 3, kind: input, shape index: {}]   ;;  %s3123_s4 = inlined_call_operand.vmem [shape: f32[32,128], index: 4, kind: input, shape index: {}]   ;;  %s3124_s5 = inlined_call_operand.vmem [shape: f32[32,128], index: 5, kind: input, shape index: {}]   ;;  %s3125_s6 = inlined_call_operand.vmem [shape: f32[1,128], index: 6, kind: input, shape index: {}]   ;;  %s3126_s7 = inlined_call_operand.vmem [shape: f32[32,1], index: 7, kind: input, shape index: {}]   ;;  %s3127_s8 = inlined_call_operand.<no memory space> [shape: f32[1,1], index: 8, kind: input, shape index: {}]   ;;  %s3128_s9 = inlined_call_operand.vmem [shape: f32[8,1], index: 9, kind: output, shape index: {}]  }
   0x1   :  { %2464 = vmatprep.subr.bf16.mxu1 %v2707_v0  ;;  %v188_v1 = vld [vmem:[%s3119_s2] sm:$0xff]  ;;  %v189_v2 = vld [vmem:[%s3119_s2 + $0x8] sm:$0xff]  ;;  %2265 = vmatprep.mubr.msk.f32.mxu1 %vm2708_vm1, %v2709_v4  ;;  %v190_v8 = vld [vmem:[%s3119_s2 + $0x10] sm:$0xff]  ;;  %vm193_vm2 = vcmask 261120   ;;  %vm2081_vm3 = vcmask 7168  }
   0x2   :  { %v42_v3 = vld [vmem:[%s3120_s1] sm:$0xff]  ;;  %v2774_v5 = vpack.c.bf16 %v189_v2, %v188_v1  ;;  %v35_v7 = vld [vmem:[%s3121_s0 + $0x8] sm:$0xff]  ;;  %v191_v9 = vld [vmem:[%s3119_s2 + $0x18] sm:$0xff] }
   0x3   :  { %2243 = vmatprep.subr.mxu0 %v42_v3  ;;  %v34_v6 = vld [vmem:[%s3121_s0] sm:$0xff]  ;;  %v2791_v10 = vpack.c.bf16 %v191_v9, %v190_v8  ;;  %v36_v46 = vld [vmem:[%s3121_s0 + $0x10] sm:$0xff]  ;;  %v37_v47 = vld [vmem:[%s3121_s0 + $0x18] sm:$0xff] }
   0x4   :  { %2244 = vmatpush3.msra.mxu0 %v42_v3  ;;  %2245 = vmatprep.mubr.msk.f32.mxu0 %vm50_vm0, %v34_v6  ;;  %v2811_v12 = vld [vmem:[%s3122_s3] ss:$0 sm:$0xff]  ;;  %s2711_s3 = smov 64   ;;  %v39_v49 = vld [vmem:[%s3121_s0 + $0x28] sm:$0xff]  ;;  %v40_v50 = vld [vmem:[%s3121_s0 + $0x30] sm:$0xff] }
   0x5   :  { %2466 = vmatpush3.bf16.msra.mxu1 %v2774_v5  ;;  %2246 = vmatmul.mubr.msk.f32.vlgmr.msra.gmra.mrb[0].mxu0 %vm50_vm0, %v35_v7  ;;  %v38_v48 = vld [vmem:[%s3121_s0 + $0x20] sm:$0xff]  ;;  %v41_v51 = vld [vmem:[%s3121_s0 + $0x38] sm:$0xff] }
   0x6   :  { %2467 = vmatprep.subr.bf16.mxu1 %v2707_v0  ;;  %2476 = vmatprep.subr.bf16.mxu0 %v2707_v0 }
   0x7   :  { %2478 = vmatpush3.bf16.msra.mxu0 %v2774_v5  ;;  %2248 = vmatprep.mubr.msk.f32.mxu0 %vm50_vm0, %v36_v46 }
   0x8   :  { %2479 = vmatprep.subr.bf16.mxu0 %v2707_v0 }
   0x9   :  { %2469 = vmatpush3.bf16.msra.mxu1 %v2791_v10  ;;  %2249 = vmatmul.mubr.msk.f32.gmra.mrb[2].mxu0 %vm50_vm0, %v37_v47 }
   0xa   :  { %2470 = vmatprep.subr.bf16.mxu1 %v2707_v0  ;;  %2251 = vmatprep.mubr.msk.f32.mxu0 %vm50_vm0, %v38_v48 }
   0xb   :  { %2481 = vmatpush3.bf16.msra.mxu0 %v2791_v10 }
   0xc   :  { %2266 = vmatmul.mubr.f32.vlgmr.msra.gmra.mrb[0].mxu1 %v2709_v4  ;;  %2488 = vmatprep.subr.bf16.mxu0 %v2707_v0 }
   0xd   :  { %2472 = vmatpush3.bf16.msra.mxu1 %v2774_v5  ;;  %2276 = vmatprep.mubr.msk.f32.mxu1 %vm2708_vm1, %v2709_v4 }
   0xe   :  { %2473 = vmatprep.subr.bf16.mxu1 %v2707_v0  ;;  %2252 = vmatmul.mubr.msk.f32.gmra.mrb[4].mxu0 %vm50_vm0, %v39_v49 }
   0xf   :  { %2254 = vmatprep.mubr.msk.f32.mxu0 %vm50_vm0, %v40_v50 }
  0x11   :  { %2475 = vmatpush3.bf16.msra.mxu1 %v2791_v10 }
  0x12   :  { %2482 = vmatprep.subr.bf16.mxu1 %v2707_v0  ;;  %2255 = vmatmul.mubr.msk.f32.gmra.mrb[6].mxu0 %vm50_vm0, %v41_v51 }
  0x13   :  { %2287 = vmatprep.mubr.msk.f32.mxu0 %vm2708_vm1, %v2709_v4 }
  0xd8   :  { %v2247_v11 = vpop.f32.mrb[0].mxu0 }
  0xd9   :  { %v141_v13 = vpop.f32.mrb[1].mxu0  ;;  %v147_v32 = vadd.f32 %v2247_v11, %v2811_v12 }
  0xda   :  { %v142_v14 = vadd.f32 %v2811_v12, %v141_v13 }
  0xdc   :  { %v2250_v55 = vpop.f32.mrb[2].mxu0 }
  0xdd   :  { %v151_v56 = vpop.f32.mrb[3].mxu0 }
  0xde   :  { %v152_v62 = vadd.f32 %v2811_v12, %v151_v56 }
  0xdf   :  { %v263_v15 = vpop.f32.mrb[0].mxu1 }
  0xe0   :  { %v267_v16 = vadd.f32 %v263_v15, %v142_v14  ;;  %v2267_v17 = vpop.f32.mrb[1].mxu1 }
  0xe1   :  { %v2857_v57 = vpop.f32.mrb[4].mxu0 }
  0xe2   :  { %2579 = vtanh.f32 %v267_v16  ;;  %v2096_v19 = vmul.f32 -1.442695, %v267_v16  ;;  %v2859_v58 = vpop.f32.mrb[5].mxu0 }
  0xe4   :  { %2581 = vpow2.f32 %v2096_v19 }
  0xe5   :  { %v2861_v59 = vpop.f32.mrb[6].mxu0 }
  0xe6   :  { %v2863_v60 = vpop.f32.mrb[7].mxu0 }
  0xec   :  { %v2580_v18 = vpop.eup %2579 }
  0xed   :  { %277 = vrot.lane.b32.xlu0 %v2580_v18, %s2710_s23 }
  0xee   :  { %v2582_v20 = vpop.eup %2581 }
  0xef   :  { %v271_v21 = vadd.f32 1.0, %v2582_v20 }
  0xf1   :  { %2583 = vrcp.f32 %v271_v21  ;;  %v157_v21 = vadd.f32 %v2250_v55, %v2811_v12 }
  0xfb   :  { %v2584_v22 = vpop.eup %2583 }
  0xfc   :  { %v275_v25 = vmul.f32 0.0, %v2584_v22 }
 0x15f   :  { %v278_v23 = vpop.permute.xlu0 %277 }
 0x160   :  { %v280_v24 = vmul.f32 %v2584_v22, %v278_v23 }
 0x162   :  { %282 = vrot.lane.b32.xlu0 %v280_v24, %s2710_s23 }
 0x1d4   :  { %v283_v26 = vpop.permute.xlu0 %282 }
 0x1d5   :  { %v285_v27 = vadd.f32 %v283_v26, %v275_v25 }
 0x1d7   :  { %2585 = vtanh.f32 %v285_v27 }
 0x1e1   :  { %v2586_v28 = vpop.eup %2585 }
 0x1e2   :  { %288 = vrot.lane.b32.xlu1 %v2586_v28, %s2710_s23 }
 0x254   :  { %v289_v29 = vpop.permute.xlu1 %288 }
 0x255   :  { %v291_v30 = vmul.f32 %v2584_v22, %v289_v29 }
 0x257   :  { %293 = vrot.lane.b32.xlu1 %v291_v30, %s2711_s3 }
 0x2c9   :  { %v294_v31 = vpop.permute.xlu1 %293 }
 0x2ca   :  { %296 = vst.msk [vmem:[#allocation3] sm:$0xff] %vm193_vm2, %v294_v31  ;;  %2277 = vmatmul.mubr.msk.f32.vlgmr.msra.gmra.mrb[2].mxu1 %vm193_vm2, %v294_v31 }
 0x2cb   :  { %2484 = vmatpush3.bf16.msra.mxu1 %v2774_v5  ;;  %2298 = vmatprep.mubr.msk.f32.mxu1 %vm2708_vm1, %v2709_v4 }
 0x2cc   :  { %2485 = vmatprep.subr.bf16.mxu1 %v2707_v0 }
 0x2cf   :  { %2487 = vmatpush3.bf16.msra.mxu1 %v2791_v10 }
 0x2d0   :  { %2494 = vmatprep.subr.bf16.mxu1 %v2707_v0 }
 0x39d   :  { %v367_v33 = vpop.f32.mrb[2].mxu1 }
 0x39e   :  { %v371_v34 = vadd.f32 %v367_v33, %v147_v32  ;;  %v2278_v35 = vpop.f32.mrb[3].mxu1 }
 0x3a0   :  { %2587 = vtanh.f32 %v371_v34  ;;  %v2098_v37 = vmul.f32 -1.442695, %v371_v34 }
 0x3a2   :  { %2589 = vpow2.f32 %v2098_v37 }
 0x3aa   :  { %v2588_v36 = vpop.eup %2587 }
 0x3ab   :  { %381 = vrot.lane.b32.xlu0 %v2588_v36, %s2710_s23 }
 0x3ac   :  { %v2590_v38 = vpop.eup %2589 }
 0x3ad   :  { %v375_v39 = vadd.f32 1.0, %v2590_v38 }
 0x3af   :  { %2591 = vrcp.f32 %v375_v39  ;;  %v162_v39 = vadd.f32 %v2811_v12, %v2859_v58  ;;  %v167_v58 = vadd.f32 %v2857_v57, %v2811_v12 }
 0x3b9   :  { %v2592_v40 = vpop.eup %2591 }
 0x3ba   :  { %v379_v43 = vmul.f32 %v2592_v40, %v285_v27 }
 0x41d   :  { %v382_v41 = vpop.permute.xlu0 %381 }
 0x41e   :  { %v384_v42 = vmul.f32 %v2592_v40, %v382_v41 }
 0x420   :  { %386 = vrot.lane.b32.xlu1 %v384_v42, %s2710_s23 }
 0x492   :  { %v387_v44 = vpop.permute.xlu1 %386 }
 0x493   :  { %v389_v45 = vadd.f32 %v387_v44, %v379_v43 }
 0x495   :  { %2593 = vtanh.f32 %v389_v45 }
 0x49f   :  { %v2594_v52 = vpop.eup %2593 }
 0x4a0   :  { %392 = vrot.lane.b32.xlu0 %v2594_v52, %s2710_s23 }
 0x512   :  { %v393_v53 = vpop.permute.xlu0 %392 }
 0x513   :  { %v395_v54 = vmul.f32 %v2592_v40, %v393_v53 }
 0x515   :  { %397 = vrot.lane.b32.xlu1 %v395_v54, %s2711_s3 }
 0x587   :  { %v398_v61 = vpop.permute.xlu1 %397 }
 0x588   :  { %401 = vst.msk [vmem:[#allocation3 + $0x8] sm:$0xff] %vm193_vm2, %v398_v61  ;;  %2288 = vmatmul.mubr.msk.f32.vlgmr.msra.gmra.mrb[8].mxu0 %vm193_vm2, %v398_v61 }
 0x589   :  { %2490 = vmatpush3.bf16.msra.mxu0 %v2774_v5  ;;  %2309 = vmatprep.mubr.msk.f32.mxu0 %vm2708_vm1, %v2709_v4 }
 0x58a   :  { %2491 = vmatprep.subr.bf16.mxu0 %v2707_v0 }
 0x58d   :  { %2493 = vmatpush3.bf16.msra.mxu0 %v2791_v10 }
 0x58e   :  { %2500 = vmatprep.subr.bf16.mxu0 %v2707_v0 }
 0x65b   :  { %v472_v63 = vpop.f32.mrb[8].mxu0 }
 0x65c   :  { %v476_v1 = vadd.f32 %v472_v63, %v152_v62  ;;  %v2289_v2 = vpop.f32.mrb[9].mxu0 }
 0x65e   :  { %2595 = vtanh.f32 %v476_v1  ;;  %v2100_v6 = vmul.f32 -1.442695, %v476_v1 }
 0x660   :  { %2597 = vpow2.f32 %v2100_v6 }
 0x668   :  { %v2596_v3 = vpop.eup %2595 }
 0x669   :  { %486 = vrot.lane.b32.xlu0 %v2596_v3, %s2710_s23 }
 0x66a   :  { %v2598_v7 = vpop.eup %2597 }
 0x66b   :  { %v480_v8 = vadd.f32 1.0, %v2598_v7 }
 0x66d   :  { %2599 = vrcp.f32 %v480_v8 }
 0x677   :  { %v2600_v9 = vpop.eup %2599 }
 0x678   :  { %v484_v14 = vmul.f32 %v2600_v9, %v389_v45 }
 0x6db   :  { %v487_v11 = vpop.permute.xlu0 %486 }
 0x6dc   :  { %v489_v13 = vmul.f32 %v2600_v9, %v487_v11  ;;  %v1040_v11 = vld [vmem:[%s3123_s4] sm:$0xff] }
 0x6de   :  { %491 = vrot.lane.b32.xlu1 %v489_v13, %s2710_s23  ;;  %v1041_v13 = vld [vmem:[%s3123_s4 + $0x8] sm:$0xff] }
 0x750   :  { %v492_v15 = vpop.permute.xlu1 %491 }
 0x751   :  { %v494_v16 = vadd.f32 %v492_v15, %v484_v14  ;;  %v2512_v14 = vpack.c.bf16 %v1041_v13, %v1040_v11 }
 0x753   :  { %2601 = vtanh.f32 %v494_v16 }
 0x75d   :  { %v2602_v17 = vpop.eup %2601 }
 0x75e   :  { %497 = vrot.lane.b32.xlu0 %v2602_v17, %s2710_s23 }
 0x7d0   :  { %v498_v18 = vpop.permute.xlu0 %497 }
 0x7d1   :  { %v500_v19 = vmul.f32 %v2600_v9, %v498_v18  ;;  %v1042_v18 = vld [vmem:[%s3123_s4 + $0x10] sm:$0xff] }
 0x7d3   :  { %502 = vrot.lane.b32.xlu1 %v500_v19, %s2711_s3  ;;  %v1043_v19 = vld [vmem:[%s3123_s4 + $0x18] sm:$0xff] }
 0x845   :  { %v503_v20 = vpop.permute.xlu1 %502 }
 0x846   :  { %506 = vst.msk [vmem:[#allocation3 + $0x10] sm:$0xff] %vm193_vm2, %v503_v20  ;;  %2299 = vmatmul.mubr.msk.f32.vlgmr.msra.gmra.mrb[4].mxu1 %vm193_vm2, %v503_v20  ;;  %v2516_v20 = vpack.c.bf16 %v1043_v19, %v1042_v18 }
 0x847   :  { %2496 = vmatpush3.bf16.msra.mxu1 %v2774_v5  ;;  %2320 = vmatprep.mubr.msk.f32.mxu1 %vm2708_vm1, %v2709_v4 }
 0x848   :  { %2497 = vmatprep.subr.bf16.mxu1 %v2707_v0 }
 0x84b   :  { %2499 = vmatpush3.bf16.msra.mxu1 %v2791_v10 }
 0x84c   :  { %2506 = vmatprep.subr.bf16.mxu1 %v2707_v0 }
 0x919   :  { %v577_v22 = vpop.f32.mrb[4].mxu1 }
 0x91a   :  { %v581_v23 = vadd.f32 %v577_v22, %v157_v21  ;;  %v2300_v24 = vpop.f32.mrb[5].mxu1  ;;  %v1032_v22 = vld [vmem:[#allocation3] sm:$0xff] }
 0x91b   :  { %v1034_v24 = vld [vmem:[#allocation3 + $0x10] sm:$0xff] }
 0x91c   :  { %2603 = vtanh.f32 %v581_v23  ;;  %v2102_v26 = vmul.f32 -1.442695, %v581_v23  ;;  %v1033_v23 = vld [vmem:[#allocation3 + $0x8] sm:$0xff] }
 0x91e   :  { %2605 = vpow2.f32 %v2102_v26 }
 0x926   :  { %v2604_v25 = vpop.eup %2603 }
 0x927   :  { %591 = vrot.lane.b32.xlu0 %v2604_v25, %s2710_s23 }
 0x928   :  { %v2606_v27 = vpop.eup %2605 }
 0x929   :  { %v585_v28 = vadd.f32 1.0, %v2606_v27 }
 0x92b   :  { %2607 = vrcp.f32 %v585_v28  ;;  %v172_v28 = vadd.f32 %v2811_v12, %v2863_v60 }
 0x935   :  { %v2608_v29 = vpop.eup %2607 }
 0x936   :  { %v589_v32 = vmul.f32 %v2608_v29, %v494_v16 }
 0x999   :  { %v592_v30 = vpop.permute.xlu0 %591 }
 0x99a   :  { %v594_v31 = vmul.f32 %v2608_v29, %v592_v30 }
 0x99c   :  { %596 = vrot.lane.b32.xlu1 %v594_v31, %s2710_s23 }
 0xa0e   :  { %v597_v33 = vpop.permute.xlu1 %596 }
 0xa0f   :  { %v599_v34 = vadd.f32 %v597_v33, %v589_v32 }
 0xa11   :  { %2609 = vtanh.f32 %v599_v34 }
 0xa1b   :  { %v2610_v35 = vpop.eup %2609 }
 0xa1c   :  { %602 = vrot.lane.b32.xlu0 %v2610_v35, %s2710_s23 }
 0xa8e   :  { %v603_v36 = vpop.permute.xlu0 %602 }
 0xa8f   :  { %v605_v37 = vmul.f32 %v2608_v29, %v603_v36 }
 0xa91   :  { %607 = vrot.lane.b32.xlu1 %v605_v37, %s2711_s3 }
 0xb03   :  { %v608_v38 = vpop.permute.xlu1 %607 }
 0xb04   :  { %611 = vst.msk [vmem:[#allocation3 + $0x18] sm:$0xff] %vm193_vm2, %v608_v38  ;;  %2310 = vmatmul.mubr.msk.f32.vlgmr.msra.gmra.mrb[10].mxu0 %vm193_vm2, %v608_v38 }
 0xb05   :  { %2502 = vmatpush3.bf16.msra.mxu0 %v2774_v5  ;;  %2331 = vmatprep.mubr.msk.f32.mxu0 %vm2708_vm1, %v2709_v4 }
 0xb06   :  { %2503 = vmatprep.subr.bf16.mxu0 %v2707_v0 }
 0xb09   :  { %2505 = vmatpush3.bf16.msra.mxu0 %v2791_v10 }
 0xb0a   :  { %2513 = vmatprep.subr.bf16.mxu0 %v2512_v14 }
 0xb0b   :  { %v1035_v25 = vld [vmem:[#allocation3 + $0x18] sm:$0xff] }
 0xbd7   :  { %v682_v40 = vpop.f32.mrb[10].mxu0 }
 0xbd8   :  { %v686_v41 = vadd.f32 %v682_v40, %v162_v39  ;;  %v2311_v42 = vpop.f32.mrb[11].mxu0 }
 0xbda   :  { %2611 = vtanh.f32 %v686_v41  ;;  %v2104_v44 = vmul.f32 -1.442695, %v686_v41 }
 0xbdc   :  { %2613 = vpow2.f32 %v2104_v44 }
 0xbe4   :  { %v2612_v43 = vpop.eup %2611 }
 0xbe5   :  { %696 = vrot.lane.b32.xlu0 %v2612_v43, %s2710_s23 }
 0xbe6   :  { %v2614_v45 = vpop.eup %2613 }
 0xbe7   :  { %v690_v46 = vadd.f32 1.0, %v2614_v45 }
 0xbe9   :  { %2615 = vrcp.f32 %v690_v46 }
 0xbf3   :  { %v2616_v47 = vpop.eup %2615 }
 0xbf4   :  { %v694_v50 = vmul.f32 %v2616_v47, %v599_v34 }
 0xc57   :  { %v697_v48 = vpop.permute.xlu0 %696 }
 0xc58   :  { %v699_v49 = vmul.f32 %v2616_v47, %v697_v48  ;;  %v1188_v48 = vld [vmem:[%s3124_s5] sm:$0xff] }
 0xc5a   :  { %701 = vrot.lane.b32.xlu1 %v699_v49, %s2710_s23  ;;  %v1189_v49 = vld [vmem:[%s3124_s5 + $0x8] sm:$0xff] }
 0xccc   :  { %v702_v51 = vpop.permute.xlu1 %701 }
 0xccd   :  { %v704_v52 = vadd.f32 %v702_v51, %v694_v50  ;;  %v2963_v50 = vpack.c.bf16 %v1189_v49, %v1188_v48  ;;  %v1190_v51 = vld [vmem:[%s3124_s5 + $0x10] sm:$0xff] }
 0xccf   :  { %2617 = vtanh.f32 %v704_v52 }
 0xcd9   :  { %v2618_v53 = vpop.eup %2617 }
 0xcda   :  { %707 = vrot.lane.b32.xlu0 %v2618_v53, %s2710_s23 }
 0xd4c   :  { %v708_v54 = vpop.permute.xlu0 %707 }
 0xd4d   :  { %v710_v55 = vmul.f32 %v2616_v47, %v708_v54 }
 0xd4f   :  { %712 = vrot.lane.b32.xlu1 %v710_v55, %s2711_s3 }
 0xdc1   :  { %v713_v56 = vpop.permute.xlu1 %712 }
 0xdc2   :  { %716 = vst.msk [vmem:[#allocation3 + $0x20] sm:$0xff] %vm193_vm2, %v713_v56  ;;  %2321 = vmatmul.mubr.msk.f32.vlgmr.msra.gmra.mrb[6].mxu1 %vm193_vm2, %v713_v56 }
 0xdc3   :  { %2508 = vmatpush3.bf16.msra.mxu1 %v2774_v5  ;;  %2342 = vmatprep.mubr.msk.f32.mxu1 %vm2708_vm1, %v2709_v4 }
 0xdc4   :  { %2509 = vmatprep.subr.bf16.mxu1 %v2707_v0 }
 0xdc7   :  { %2511 = vmatpush3.bf16.msra.mxu1 %v2791_v10 }
 0xdc8   :  { %2520 = vmatprep.subr.bf16.mxu1 %v2707_v0 }
 0xdc9   :  { %v1036_v26 = vld [vmem:[#allocation3 + $0x20] sm:$0xff] }
 0xe95   :  { %v787_v61 = vpop.f32.mrb[6].mxu1 }
 0xe96   :  { %v791_v62 = vadd.f32 %v787_v61, %v167_v58  ;;  %v2322_v63 = vpop.f32.mrb[7].mxu1  ;;  %v177_v61 = vadd.f32 %v2861_v59, %v2811_v12 }
 0xe98   :  { %2619 = vtanh.f32 %v791_v62  ;;  %v2106_v5 = vmul.f32 -1.442695, %v791_v62 }
 0xe9a   :  { %2621 = vpow2.f32 %v2106_v5  ;;  %v2999_v5 = vld [vmem:[%s3125_s6] ss:$0 sm:$0xff] }
 0xea2   :  { %v2620_v1 = vpop.eup %2619 }
 0xea3   :  { %801 = vrot.lane.b32.xlu0 %v2620_v1, %s2710_s23 }
 0xea4   :  { %v2622_v2 = vpop.eup %2621 }
 0xea5   :  { %v795_v3 = vadd.f32 1.0, %v2622_v2 }
 0xea7   :  { %2623 = vrcp.f32 %v795_v3 }
 0xeb1   :  { %v2624_v6 = vpop.eup %2623 }
 0xeb2   :  { %v799_v8 = vmul.f32 %v2624_v6, %v704_v52  ;;  %v1191_v52 = vld [vmem:[%s3124_s5 + $0x18] sm:$0xff] }
 0xeb3   :  { %v2973_v53 = vpack.c.bf16 %v1191_v52, %v1190_v51 }
 0xf15   :  { %v802_v7 = vpop.permute.xlu0 %801 }
 0xf16   :  { %v804_v10 = vmul.f32 %v2624_v6, %v802_v7 }
 0xf18   :  { %806 = vrot.lane.b32.xlu1 %v804_v10, %s2710_s23 }
 0xf8a   :  { %v807_v9 = vpop.permute.xlu1 %806 }
 0xf8b   :  { %v809_v57 = vadd.f32 %v807_v9, %v799_v8 }
 0xf8d   :  { %2625 = vtanh.f32 %v809_v57 }
 0xf97   :  { %v2626_v15 = vpop.eup %2625 }
 0xf98   :  { %812 = vrot.lane.b32.xlu0 %v2626_v15, %s2710_s23 }
0x100a   :  { %v813_v16 = vpop.permute.xlu0 %812 }
0x100b   :  { %v815_v17 = vmul.f32 %v2624_v6, %v813_v16 }
0x100d   :  { %817 = vrot.lane.b32.xlu1 %v815_v17, %s2711_s3 }
0x107f   :  { %v818_v21 = vpop.permute.xlu1 %817 }
0x1080   :  { %821 = vst.msk [vmem:[#allocation3 + $0x28] sm:$0xff] %vm193_vm2, %v818_v21  ;;  %2332 = vmatmul.mubr.msk.f32.vlgmr.msra.gmra.mrb[12].mxu0 %vm193_vm2, %v818_v21 }
0x1081   :  { %2515 = vmatpush3.bf16.msra.mxu0 %v2512_v14  ;;  %2353 = vmatprep.mubr.msk.f32.mxu0 %vm193_vm2, %v1032_v22 }
0x1082   :  { %2517 = vmatprep.subr.bf16.mxu0 %v2516_v20 }
0x1085   :  { %2519 = vmatpush3.bf16.msra.mxu0 %v2516_v20 }
0x1086   :  { %2532 = vmatprep.subr.bf16.mxu0 %v2707_v0 }
0x1087   :  { %v1037_v27 = vld [vmem:[#allocation3 + $0x28] sm:$0xff] }
0x1088   :  { %2354 = vmatmul.mubr.msk.f32.vlgmr.msra.gmra.mrb[14].mxu0 %vm193_vm2, %v1033_v23 }
0x1089   :  { %2356 = vmatprep.mubr.msk.f32.mxu0 %vm193_vm2, %v1034_v24  ;;  %2534 = vmatpush3.bf16.msra.mxu0 %v2963_v50 }
0x108a   :  { %2535 = vmatprep.subr.bf16.mxu0 %v2707_v0 }
0x108c   :  { %2357 = vmatmul.mubr.msk.f32.gmra.mrb[16].mxu0 %vm193_vm2, %v1035_v25 }
0x108d   :  { %2359 = vmatprep.mubr.msk.f32.mxu0 %vm193_vm2, %v1036_v26  ;;  %2537 = vmatpush3.bf16.msra.mxu0 %v2973_v53 }
0x108e   :  { %2544 = vmatprep.subr.bf16.mxu0 %v2707_v0 }
0x1090   :  { %2360 = vmatmul.mubr.msk.f32.gmra.mrb[18].mxu0 %vm193_vm2, %v1037_v27 }
0x1153   :  { %v892_v29 = vpop.f32.mrb[12].mxu0 }
0x1154   :  { %v896_v30 = vadd.f32 %v892_v29, %v172_v28  ;;  %v2333_v31 = vpop.f32.mrb[13].mxu0 }
0x1156   :  { %2627 = vtanh.f32 %v896_v30  ;;  %v2108_v39 = vmul.f32 -1.442695, %v896_v30 }
0x1158   :  { %2629 = vpow2.f32 %v2108_v39 }
0x115b   :  { %v2941_v32 = vpop.f32.mrb[14].mxu0 }
0x115c   :  { %v1141_v33 = vpop.f32.mrb[15].mxu0 }
0x115d   :  { %v1142_v2 = vadd.f32 %v2999_v5, %v1141_v33 }
0x115f   :  { %v2943_v34 = vpop.f32.mrb[16].mxu0 }
0x1160   :  { %v2628_v35 = vpop.eup %2627  ;;  %v2945_v36 = vpop.f32.mrb[17].mxu0 }
0x1161   :  { %906 = vrot.lane.b32.xlu0 %v2628_v35, %s2710_s23  ;;  %v1147_v35 = vadd.f32 %v2941_v32, %v2999_v5 }
0x1162   :  { %v2630_v60 = vpop.eup %2629 }
0x1163   :  { %v2948_v37 = vpop.f32.mrb[18].mxu0  ;;  %v900_v40 = vadd.f32 1.0, %v2630_v60 }
0x1164   :  { %v2950_v38 = vpop.f32.mrb[19].mxu0 }
0x1165   :  { %2631 = vrcp.f32 %v900_v40 }
0x116f   :  { %v2632_v41 = vpop.eup %2631 }
0x1170   :  { %v904_v44 = vmul.f32 %v2632_v41, %v809_v57 }
0x11d3   :  { %v907_v42 = vpop.permute.xlu0 %906 }
0x11d4   :  { %v909_v43 = vmul.f32 %v2632_v41, %v907_v42 }
0x11d6   :  { %911 = vrot.lane.b32.xlu1 %v909_v43, %s2710_s23 }
0x1248   :  { %v912_v45 = vpop.permute.xlu1 %911 }
0x1249   :  { %v2953_v46 = vadd.f32 %v912_v45, %v904_v44 }
0x124b   :  { %2633 = vtanh.f32 %v2953_v46 }
0x1255   :  { %v2634_v47 = vpop.eup %2633 }
0x1256   :  { %917 = vrot.lane.b32.xlu0 %v2634_v47, %s2710_s23 }
0x12c8   :  { %v918_v54 = vpop.permute.xlu0 %917 }
0x12c9   :  { %v920_v55 = vmul.f32 %v2632_v41, %v918_v54 }
0x12cb   :  { %922 = vrot.lane.b32.xlu1 %v920_v55, %s2711_s3 }
0x133d   :  { %v923_v56 = vpop.permute.xlu1 %922 }
0x133e   :  { %926 = vst.msk [vmem:[#allocation3 + $0x30] sm:$0xff] %vm193_vm2, %v923_v56  ;;  %2343 = vmatmul.mubr.msk.f32.vlgmr.msra.gmra.mrb[8].mxu1 %vm193_vm2, %v923_v56 }
0x133f   :  { %2522 = vmatpush3.bf16.msra.mxu1 %v2963_v50  ;;  %2373 = vmatprep.mubr.msk.f32.mxu1 %vm2708_vm1, %v2709_v4 }
0x1340   :  { %2523 = vmatprep.subr.bf16.mxu1 %v2707_v0 }
0x1343   :  { %2525 = vmatpush3.bf16.msra.mxu1 %v2973_v53 }
0x1344   :  { %2526 = vmatprep.subr.bf16.mxu1 %v2707_v0 }
0x1345   :  { %v1038_v58 = vld [vmem:[#allocation3 + $0x30] sm:$0xff] }
0x1346   :  { %2374 = vmatmul.mubr.f32.vlgmr.msra.gmra.mrb[10].mxu1 %v2709_v4  ;;  %2362 = vmatprep.mubr.msk.f32.mxu0 %vm193_vm2, %v1038_v58 }
0x1347   :  { %2528 = vmatpush3.bf16.msra.mxu1 %v2963_v50  ;;  %2384 = vmatprep.mubr.msk.f32.mxu1 %vm2708_vm1, %v2709_v4 }
0x1348   :  { %2529 = vmatprep.subr.bf16.mxu1 %v2707_v0 }
0x134b   :  { %2531 = vmatpush3.bf16.msra.mxu1 %v2973_v53 }
0x134c   :  { %2538 = vmatprep.subr.bf16.mxu1 %v2707_v0 }
0x1411   :  { %v997_v62 = vpop.f32.mrb[8].mxu1 }
0x1412   :  { %v1001_v63 = vadd.f32 %v997_v62, %v177_v61  ;;  %v2344_v1 = vpop.f32.mrb[9].mxu1 }
0x1414   :  { %v2110_v18 = vmul.f32 -1.442695, %v1001_v63 }
0x1419   :  { %v1259_v3 = vpop.f32.mrb[10].mxu1 }
0x141a   :  { %v1263_v6 = vadd.f32 %v1259_v3, %v1142_v2  ;;  %v2375_v7 = vpop.f32.mrb[11].mxu1 }
0x141c   :  { %2635 = vtanh.f32 %v1263_v6  ;;  %v2120_v8 = vmul.f32 -1.442695, %v1263_v6 }
0x141e   :  { %2637 = vpow2.f32 %v2120_v8 }
0x1426   :  { %v2636_v10 = vpop.eup %2635 }
0x1427   :  { %1273 = vrot.lane.b32.xlu0 %v2636_v10, %s2710_s23 }
0x1428   :  { %v2638_v12 = vpop.eup %2637 }
0x1429   :  { %v1267_v59 = vadd.f32 1.0, %v2638_v12 }
0x142b   :  { %2639 = vrcp.f32 %v1267_v59 }
0x1435   :  { %v2640_v9 = vpop.eup %2639 }
0x1436   :  { %v1271_v13 = vmul.f32 0.0, %v2640_v9 }
0x1499   :  { %v1274_v57 = vpop.permute.xlu0 %1273 }
0x149a   :  { %v1276_v11 = vmul.f32 %v2640_v9, %v1274_v57 }
0x149c   :  { %1278 = vrot.lane.b32.xlu1 %v1276_v11, %s2710_s23 }
0x150e   :  { %v1279_v14 = vpop.permute.xlu1 %1278 }
0x150f   :  { %v1281_v15 = vadd.f32 %v1279_v14, %v1271_v13 }
0x1511   :  { %2641 = vtanh.f32 %v1281_v15 }
0x1512   :  { %2643 = vtanh.f32 %v1001_v63  ;;  %v1152_v63 = vadd.f32 %v2999_v5, %v2945_v36 }
0x1513   :  { %2645 = vpow2.f32 %v2110_v18 }
0x151b   :  { %v2642_v16 = vpop.eup %2641 }
0x151c   :  { %1284 = vrot.lane.b32.xlu0 %v2642_v16, %s2710_s23  ;;  %v2644_v17 = vpop.eup %2643 }
0x151d   :  { %v2646_v19 = vpop.eup %2645 }
0x151e   :  { %v1005_v20 = vadd.f32 1.0, %v2646_v19 }
0x1520   :  { %1011 = vrot.lane.b32.xlu0 %v2644_v17, %s2710_s23  ;;  %2647 = vrcp.f32 %v1005_v20  ;;  %v1157_v17 = vadd.f32 %v2943_v34, %v2999_v5 }
0x152a   :  { %v2648_v23 = vpop.eup %2647 }
0x152b   :  { %v1009_v27 = vmul.f32 %v2648_v23, %v2953_v46 }
0x158e   :  { %v1285_v21 = vpop.permute.xlu0 %1284 }
0x158f   :  { %v1287_v22 = vmul.f32 %v2640_v9, %v1285_v21 }
0x1591   :  { %1290 = vrot.lane.b32.xlu1 %v1287_v22, %s2711_s3 }
0x1592   :  { %v1012_v24 = vpop.permute.xlu0 %1011 }
0x1593   :  { %v1014_v25 = vmul.f32 %v2648_v23, %v1012_v24 }
0x1595   :  { %1016 = vrot.lane.b32.xlu0 %v1014_v25, %s2710_s23 }
0x1603   :  { %v1291_v26 = vpop.permute.xlu1 %1290 }
0x1604   :  { %2385 = vmatmul.mubr.msk.f32.vlgmr.msra.gmra.mrb[12].mxu1 %vm193_vm2, %v1291_v26 }
0x1605   :  { %2540 = vmatpush3.bf16.msra.mxu1 %v2963_v50  ;;  %2406 = vmatprep.mubr.msk.f32.mxu1 %vm2708_vm1, %v2709_v4 }
0x1606   :  { %2541 = vmatprep.subr.bf16.mxu1 %v2707_v0 }
0x1607   :  { %v1017_v28 = vpop.permute.xlu0 %1016 }
0x1608   :  { %v1019_v29 = vadd.f32 %v1017_v28, %v1009_v27 }
0x1609   :  { %2543 = vmatpush3.bf16.msra.mxu1 %v2973_v53 }
0x160a   :  { %2649 = vtanh.f32 %v1019_v29  ;;  %2550 = vmatprep.subr.bf16.mxu1 %v2707_v0 }
0x1614   :  { %v2650_v30 = vpop.eup %2649 }
0x1615   :  { %1022 = vrot.lane.b32.xlu0 %v2650_v30, %s2710_s23 }
0x1687   :  { %v1023_v31 = vpop.permute.xlu0 %1022 }
0x1688   :  { %v1025_v33 = vmul.f32 %v2648_v23, %v1023_v31 }
0x168a   :  { %1027 = vrot.lane.b32.xlu0 %v1025_v33, %s2711_s3 }
0x16d7   :  { %v1360_v39 = vpop.f32.mrb[12].mxu1 }
0x16d8   :  { %v1364_v60 = vadd.f32 %v1360_v39, %v1147_v35  ;;  %v2386_v40 = vpop.f32.mrb[13].mxu1  ;;  %v1162_v39 = vadd.f32 %v2999_v5, %v2950_v38 }
0x16da   :  { %2651 = vtanh.f32 %v1364_v60  ;;  %v2122_v44 = vmul.f32 -1.442695, %v1364_v60 }
0x16dc   :  { %2653 = vpow2.f32 %v2122_v44 }
0x16e4   :  { %v2652_v41 = vpop.eup %2651 }
0x16e5   :  { %1374 = vrot.lane.b32.xlu1 %v2652_v41, %s2710_s23 }
0x16e6   :  { %v2654_v45 = vpop.eup %2653 }
0x16e7   :  { %v1368_v32 = vadd.f32 1.0, %v2654_v45 }
0x16e9   :  { %2655 = vrcp.f32 %v1368_v32 }
0x16f3   :  { %v2656_v46 = vpop.eup %2655 }
0x16f4   :  { %v1372_v49 = vmul.f32 %v2656_v46, %v1281_v15 }
0x16fc   :  { %v1028_v42 = vpop.permute.xlu0 %1027 }
0x16fd   :  { %1031 = vst.msk [vmem:[#allocation3 + $0x38] sm:$0xff] %vm193_vm2, %v1028_v42 }
0x1704   :  { %v1039_v43 = vld [vmem:[#allocation3 + $0x38] sm:$0xff] }
0x1705   :  { %2363 = vmatmul.mubr.msk.f32.gmra.mrb[20].mxu0 %vm193_vm2, %v1039_v43 }
0x1706   :  { %2395 = vmatprep.mubr.msk.f32.mxu0 %vm2708_vm1, %v2709_v4 }
0x1757   :  { %v1375_v47 = vpop.permute.xlu1 %1374 }
0x1758   :  { %v1377_v48 = vmul.f32 %v2656_v46, %v1375_v47 }
0x175a   :  { %1379 = vrot.lane.b32.xlu1 %v1377_v48, %s2710_s23 }
0x17cc   :  { %v1380_v51 = vpop.permute.xlu1 %1379 }
0x17cd   :  { %v1382_v52 = vadd.f32 %v1380_v51, %v1372_v49 }
0x17cf   :  { %2657 = vtanh.f32 %v1382_v52 }
0x17d8   :  { %v3026_v54 = vpop.f32.mrb[20].mxu0 }
0x17d9   :  { %v2658_v55 = vpop.eup %2657  ;;  %v3028_v56 = vpop.f32.mrb[21].mxu0 }
0x17da   :  { %1385 = vrot.lane.b32.xlu1 %v2658_v55, %s2710_s23 }
0x184c   :  { %v1386_v58 = vpop.permute.xlu1 %1385 }
0x184d   :  { %v1388_v61 = vmul.f32 %v2656_v46, %v1386_v58 }
0x184f   :  { %1391 = vrot.lane.b32.xlu1 %v1388_v61, %s2711_s3  ;;  %v1167_v61 = vadd.f32 %v2948_v37, %v2999_v5 }
0x18c1   :  { %v1392_v62 = vpop.permute.xlu1 %1391 }
0x18c2   :  { %2396 = vmatmul.mubr.msk.f32.vlgmr.msra.gmra.mrb[22].mxu0 %vm193_vm2, %v1392_v62 }
0x18c3   :  { %2546 = vmatpush3.bf16.msra.mxu0 %v2963_v50  ;;  %2417 = vmatprep.mubr.msk.f32.mxu0 %vm2708_vm1, %v2709_v4 }
0x18c4   :  { %2547 = vmatprep.subr.bf16.mxu0 %v2707_v0 }
0x18c7   :  { %2549 = vmatpush3.bf16.msra.mxu0 %v2973_v53 }
0x18c8   :  { %2556 = vmatprep.subr.bf16.mxu0 %v2707_v0 }
0x1995   :  { %v1461_v1 = vpop.f32.mrb[22].mxu0 }
0x1996   :  { %v1465_v2 = vadd.f32 %v1461_v1, %v1152_v63  ;;  %v2397_v3 = vpop.f32.mrb[23].mxu0 }
0x1998   :  { %2659 = vtanh.f32 %v1465_v2  ;;  %v2124_v7 = vmul.f32 -1.442695, %v1465_v2 }
0x199a   :  { %2661 = vpow2.f32 %v2124_v7 }
0x19a2   :  { %v2660_v6 = vpop.eup %2659 }
0x19a3   :  { %1475 = vrot.lane.b32.xlu0 %v2660_v6, %s2710_s23 }
0x19a4   :  { %v2662_v10 = vpop.eup %2661 }
0x19a5   :  { %v1469_v8 = vadd.f32 1.0, %v2662_v10 }
0x19a7   :  { %2663 = vrcp.f32 %v1469_v8 }
0x19b1   :  { %v2664_v12 = vpop.eup %2663 }
0x19b2   :  { %v1473_v57 = vmul.f32 %v2664_v12, %v1382_v52 }
0x1a15   :  { %v1476_v59 = vpop.permute.xlu0 %1475 }
0x1a16   :  { %v1478_v9 = vmul.f32 %v2664_v12, %v1476_v59 }
0x1a18   :  { %1480 = vrot.lane.b32.xlu1 %v1478_v9, %s2710_s23 }
0x1a8a   :  { %v1481_v11 = vpop.permute.xlu1 %1480 }
0x1a8b   :  { %v1483_v36 = vadd.f32 %v1481_v11, %v1473_v57 }
0x1a8d   :  { %2665 = vtanh.f32 %v1483_v36 }
0x1a97   :  { %v2666_v13 = vpop.eup %2665 }
0x1a98   :  { %1486 = vrot.lane.b32.xlu0 %v2666_v13, %s2710_s23 }
0x1b0a   :  { %v1487_v14 = vpop.permute.xlu0 %1486 }
0x1b0b   :  { %v1489_v15 = vmul.f32 %v2664_v12, %v1487_v14 }
0x1b0d   :  { %1492 = vrot.lane.b32.xlu1 %v1489_v15, %s2711_s3 }
0x1b7f   :  { %v1493_v16 = vpop.permute.xlu1 %1492 }
0x1b80   :  { %2407 = vmatmul.mubr.msk.f32.vlgmr.msra.gmra.mrb[14].mxu1 %vm193_vm2, %v1493_v16 }
0x1b81   :  { %2552 = vmatpush3.bf16.msra.mxu1 %v2963_v50  ;;  %2428 = vmatprep.mubr.msk.f32.mxu1 %vm2708_vm1, %v2709_v4 }
0x1b82   :  { %2553 = vmatprep.subr.bf16.mxu1 %v2707_v0 }
0x1b85   :  { %2555 = vmatpush3.bf16.msra.mxu1 %v2973_v53 }
0x1b86   :  { %2562 = vmatprep.subr.bf16.mxu1 %v2707_v0 }
0x1c53   :  { %v1562_v18 = vpop.f32.mrb[14].mxu1 }
0x1c54   :  { %v1566_v19 = vadd.f32 %v1562_v18, %v1157_v17  ;;  %v2408_v20 = vpop.f32.mrb[15].mxu1 }
0x1c56   :  { %2667 = vtanh.f32 %v1566_v19  ;;  %v2126_v22 = vmul.f32 -1.442695, %v1566_v19 }
0x1c58   :  { %2669 = vpow2.f32 %v2126_v22 }
0x1c60   :  { %v2668_v21 = vpop.eup %2667 }
0x1c61   :  { %1576 = vrot.lane.b32.xlu0 %v2668_v21, %s2710_s23 }
0x1c62   :  { %v2670_v23 = vpop.eup %2669 }
0x1c63   :  { %v1570_v24 = vadd.f32 1.0, %v2670_v23 }
0x1c65   :  { %2671 = vrcp.f32 %v1570_v24 }
0x1c6f   :  { %v2672_v25 = vpop.eup %2671 }
0x1c70   :  { %v1574_v28 = vmul.f32 %v2672_v25, %v1483_v36  ;;  %v1172_v36 = vadd.f32 %v2999_v5, %v3028_v56 }
0x1cd3   :  { %v1577_v26 = vpop.permute.xlu0 %1576 }
0x1cd4   :  { %v1579_v27 = vmul.f32 %v2672_v25, %v1577_v26 }
0x1cd6   :  { %1581 = vrot.lane.b32.xlu1 %v1579_v27, %s2710_s23 }
0x1d48   :  { %v1582_v29 = vpop.permute.xlu1 %1581 }
0x1d49   :  { %v1584_v34 = vadd.f32 %v1582_v29, %v1574_v28  ;;  %v1177_v28 = vadd.f32 %v3026_v54, %v2999_v5  ;;  %v1995_v54 = vld [vmem:[%s3126_s7] sm:$0xff] }
0x1d4b   :  { %2673 = vtanh.f32 %v1584_v34 }
0x1d55   :  { %v2674_v30 = vpop.eup %2673 }
0x1d56   :  { %1587 = vrot.lane.b32.xlu0 %v2674_v30, %s2710_s23 }
0x1dc8   :  { %v1588_v31 = vpop.permute.xlu0 %1587 }
0x1dc9   :  { %v1590_v33 = vmul.f32 %v2672_v25, %v1588_v31 }
0x1dcb   :  { %1593 = vrot.lane.b32.xlu1 %v1590_v33, %s2711_s3 }
0x1e3d   :  { %v1594_v35 = vpop.permute.xlu1 %1593 }
0x1e3e   :  { %2418 = vmatmul.mubr.msk.f32.vlgmr.msra.gmra.mrb[24].mxu0 %vm193_vm2, %v1594_v35 }
0x1e3f   :  { %2558 = vmatpush3.bf16.msra.mxu0 %v2963_v50  ;;  %2439 = vmatprep.mubr.msk.f32.mxu0 %vm2708_vm1, %v2709_v4 }
0x1e40   :  { %2559 = vmatprep.subr.bf16.mxu0 %v2707_v0 }
0x1e43   :  { %2561 = vmatpush3.bf16.msra.mxu0 %v2973_v53 }
0x1e44   :  { %2568 = vmatprep.subr.bf16.mxu0 %v2707_v0 }
0x1f11   :  { %v1663_v60 = vpop.f32.mrb[24].mxu0 }
0x1f12   :  { %v1667_v40 = vadd.f32 %v1663_v60, %v1162_v39  ;;  %v2419_v41 = vpop.f32.mrb[25].mxu0 }
0x1f14   :  { %2675 = vtanh.f32 %v1667_v40  ;;  %v2128_v43 = vmul.f32 -1.442695, %v1667_v40 }
0x1f16   :  { %2677 = vpow2.f32 %v2128_v43 }
0x1f1e   :  { %v2676_v42 = vpop.eup %2675 }
0x1f1f   :  { %1677 = vrot.lane.b32.xlu0 %v2676_v42, %s2710_s23 }
0x1f20   :  { %v2678_v44 = vpop.eup %2677 }
0x1f21   :  { %v1671_v45 = vadd.f32 1.0, %v2678_v44  ;;  %v1996_v44 = vld [vmem:[%s3126_s7 + $0x8] sm:$0xff] }
0x1f23   :  { %2679 = vrcp.f32 %v1671_v45  ;;  %v1997_v45 = vld [vmem:[%s3126_s7 + $0x10] sm:$0xff] }
0x1f2d   :  { %v2680_v32 = vpop.eup %2679 }
0x1f2e   :  { %v1675_v48 = vmul.f32 %v2680_v32, %v1584_v34 }
0x1f91   :  { %v1678_v46 = vpop.permute.xlu0 %1677 }
0x1f92   :  { %v1680_v47 = vmul.f32 %v2680_v32, %v1678_v46  ;;  %v1998_v46 = vld [vmem:[%s3126_s7 + $0x18] sm:$0xff] }
0x1f94   :  { %1682 = vrot.lane.b32.xlu1 %v1680_v47, %s2710_s23  ;;  %v2572_v47 = vpack.c.bf16 %v1998_v46, %v1997_v45 }
0x2006   :  { %v1683_v49 = vpop.permute.xlu1 %1682 }
0x2007   :  { %v1685_v38 = vadd.f32 %v1683_v49, %v1675_v48  ;;  %v14_v49 = vstv %s3127_s8 }
0x2008   :  { %15 = vst [vmem:[#allocation4] sm:$0x1] %v14_v49 }
0x2009   :  { %2681 = vtanh.f32 %v1685_v38 }
0x2013   :  { %v2682_v51 = vpop.eup %2681 }
0x2014   :  { %1688 = vrot.lane.b32.xlu0 %v2682_v51, %s2710_s23 }
0x2086   :  { %v1689_v52 = vpop.permute.xlu0 %1688 }
0x2087   :  { %v1691_v55 = vmul.f32 %v2680_v32, %v1689_v52  ;;  %v2569_v32 = vpack.c.bf16 %v1996_v44, %v1995_v54 }
0x2089   :  { %1694 = vrot.lane.b32.xlu1 %v1691_v55, %s2711_s3  ;;  %v2135_v55 = vld [vmem:[#allocation4] ss:$0 sm:$0xff] }
0x20fb   :  { %v1695_v58 = vpop.permute.xlu1 %1694 }
0x20fc   :  { %2429 = vmatmul.mubr.msk.f32.vlgmr.msra.gmra.mrb[16].mxu1 %vm193_vm2, %v1695_v58 }
0x20fd   :  { %2564 = vmatpush3.bf16.msra.mxu1 %v2963_v50  ;;  %2450 = vmatprep.mubr.msk.f32.mxu1 %vm2708_vm1, %v2709_v4 }
0x20fe   :  { %2565 = vmatprep.subr.bf16.mxu1 %v2707_v0 }
0x2101   :  { %2567 = vmatpush3.bf16.msra.mxu1 %v2973_v53 }
0x21cf   :  { %v1764_v62 = vpop.f32.mrb[16].mxu1 }
0x21d0   :  { %v1768_v63 = vadd.f32 %v1764_v62, %v1167_v61  ;;  %v2430_v1 = vpop.f32.mrb[17].mxu1 }
0x21d2   :  { %2683 = vtanh.f32 %v1768_v63  ;;  %v2130_v3 = vmul.f32 -1.442695, %v1768_v63 }
0x21d4   :  { %2685 = vpow2.f32 %v2130_v3 }
0x21dc   :  { %v2684_v2 = vpop.eup %2683 }
0x21dd   :  { %1778 = vrot.lane.b32.xlu0 %v2684_v2, %s2710_s23 }
0x21de   :  { %v2686_v50 = vpop.eup %2685 }
0x21df   :  { %v1772_v6 = vadd.f32 1.0, %v2686_v50 }
0x21e1   :  { %2687 = vrcp.f32 %v1772_v6 }
0x21eb   :  { %v2688_v7 = vpop.eup %2687 }
0x21ec   :  { %v1776_v53 = vmul.f32 %v2688_v7, %v1685_v38 }
0x224f   :  { %v1779_v10 = vpop.permute.xlu0 %1778 }
0x2250   :  { %v1781_v8 = vmul.f32 %v2688_v7, %v1779_v10 }
0x2252   :  { %1783 = vrot.lane.b32.xlu1 %v1781_v8, %s2710_s23 }
0x22c4   :  { %v1784_v12 = vpop.permute.xlu1 %1783 }
0x22c5   :  { %v1786_v37 = vadd.f32 %v1784_v12, %v1776_v53 }
0x22c7   :  { %2689 = vtanh.f32 %v1786_v37 }
0x22d1   :  { %v2690_v59 = vpop.eup %2689 }
0x22d2   :  { %1789 = vrot.lane.b32.xlu0 %v2690_v59, %s2710_s23 }
0x2344   :  { %v1790_v9 = vpop.permute.xlu0 %1789 }
0x2345   :  { %v1792_v57 = vmul.f32 %v2688_v7, %v1790_v9 }
0x2347   :  { %1795 = vrot.lane.b32.xlu1 %v1792_v57, %s2711_s3 }
0x23b9   :  { %v1796_v11 = vpop.permute.xlu1 %1795 }
0x23ba   :  { %2440 = vmatmul.mubr.msk.f32.vlgmr.msra.gmra.mrb[26].mxu0 %vm193_vm2, %v1796_v11 }
0x23bb   :  { %2461 = vmatprep.mubr.msk.f32.mxu0 %vm2708_vm1, %v2709_v4  ;;  %2570 = vmatpush3.bf16.msra.mxu0 %v2569_v32 }
0x23bc   :  { %2571 = vmatprep.subr.bf16.mxu0 %v2707_v0 }
0x23bf   :  { %2573 = vmatpush3.bf16.msra.mxu0 %v2572_v47 }
0x248d   :  { %v1865_v13 = vpop.f32.mrb[26].mxu0 }
0x248e   :  { %v1869_v14 = vadd.f32 %v1865_v13, %v1172_v36  ;;  %v2441_v15 = vpop.f32.mrb[27].mxu0 }
0x2490   :  { %2691 = vtanh.f32 %v1869_v14  ;;  %v2132_v17 = vmul.f32 -1.442695, %v1869_v14 }
0x2492   :  { %2693 = vpow2.f32 %v2132_v17 }
0x249a   :  { %v2692_v16 = vpop.eup %2691 }
0x249b   :  { %1879 = vrot.lane.b32.xlu0 %v2692_v16, %s2710_s23 }
0x249c   :  { %v2694_v18 = vpop.eup %2693 }
0x249d   :  { %v1873_v19 = vadd.f32 1.0, %v2694_v18 }
0x249f   :  { %2695 = vrcp.f32 %v1873_v19 }
0x24a9   :  { %v2696_v20 = vpop.eup %2695 }
0x24aa   :  { %v1877_v4 = vmul.f32 %v2696_v20, %v1786_v37 }
0x250d   :  { %v1880_v21 = vpop.permute.xlu0 %1879 }
0x250e   :  { %v1882_v22 = vmul.f32 %v2696_v20, %v1880_v21 }
0x2510   :  { %1884 = vrot.lane.b32.xlu1 %v1882_v22, %s2710_s23 }
0x2582   :  { %v1885_v23 = vpop.permute.xlu1 %1884 }
0x2583   :  { %v1887_v56 = vadd.f32 %v1885_v23, %v1877_v4 }
0x2585   :  { %2697 = vtanh.f32 %v1887_v56 }
0x258f   :  { %v2698_v24 = vpop.eup %2697 }
0x2590   :  { %1890 = vrot.lane.b32.xlu0 %v2698_v24, %s2710_s23 }
0x2602   :  { %v1891_v25 = vpop.permute.xlu0 %1890 }
0x2603   :  { %v1893_v26 = vmul.f32 %v2696_v20, %v1891_v25 }
0x2605   :  { %1896 = vrot.lane.b32.xlu1 %v1893_v26, %s2711_s3 }
0x2677   :  { %v1897_v27 = vpop.permute.xlu1 %1896 }
0x2678   :  { %2451 = vmatmul.mubr.msk.f32.vlgmr.msra.gmra.mrb[18].mxu1 %vm193_vm2, %v1897_v27 }
0x274b   :  { %v1966_v29 = vpop.f32.mrb[18].mxu1 }
0x274c   :  { %v1970_v34 = vadd.f32 %v1966_v29, %v1177_v28  ;;  %v2452_v30 = vpop.f32.mrb[19].mxu1 }
0x274e   :  { %2699 = vtanh.f32 %v1970_v34  ;;  %v2134_v33 = vmul.f32 -1.442695, %v1970_v34 }
0x2750   :  { %2701 = vpow2.f32 %v2134_v33 }
0x2758   :  { %v2700_v31 = vpop.eup %2699 }
0x2759   :  { %1980 = vrot.lane.b32.xlu0 %v2700_v31, %s2710_s23 }
0x275a   :  { %v2702_v35 = vpop.eup %2701 }
0x275b   :  { %v1974_v39 = vadd.f32 1.0, %v2702_v35 }
0x275d   :  { %2703 = vrcp.f32 %v1974_v39 }
0x2767   :  { %v2704_v60 = vpop.eup %2703 }
0x2768   :  { %v1978_v42 = vmul.f32 %v2704_v60, %v1887_v56 }
0x27cb   :  { %v1981_v40 = vpop.permute.xlu0 %1980 }
0x27cc   :  { %v1983_v41 = vmul.f32 %v2704_v60, %v1981_v40 }
0x27ce   :  { %1985 = vrot.lane.b32.xlu1 %v1983_v41, %s2710_s23 }
0x2840   :  { %v1986_v43 = vpop.permute.xlu1 %1985 }
0x2841   :  { %v1988_v5 = vadd.f32 %v1986_v43, %v1978_v42 }
0x2843   :  { %2705 = vtanh.f32 %v1988_v5 }
0x284d   :  { %v2706_v48 = vpop.eup %2705 }
0x284e   :  { %1991 = vrot.lane.b32.xlu0 %v2706_v48, %s2710_s23 }
0x28c0   :  { %v1992_v38 = vpop.permute.xlu0 %1991 }
0x28c1   :  { %v1994_v51 = vmul.f32 %v2704_v60, %v1992_v38 }
0x28c3   :  { %2007 = vrot.lane.b32.xlu1 %v1994_v51, %s2711_s3 }
0x2935   :  { %v2008_v52 = vpop.permute.xlu1 %2007 }
0x2936   :  { %2462 = vmatmul.mubr.msk.f32.vlgmr.msra.gmra.mrb[28].mxu0 %vm193_vm2, %v2008_v52 }
0x2a09   :  { %v2077_v58 = vpop.f32.mrb[28].mxu0 }
0x2a0a   :  { %v2078_v0 = vadd.f32 %v2135_v55, %v2077_v58  ;;  %v2463_v61 = vpop.f32.mrb[29].mxu0 }
0x2a0c   :  { %2082 = vst.msk [vmem:[%s3128_s9] sm:$0xff] %vm2081_vm3, %v2078_v0 }

</bundles_post_ra>
